<compile_context>
chip_gen: v6e
topology: v6e:2x2x1
jax: 0.10.0
libtpu: 0.0.40
codegen_flags: <defaults>
</compile_context>

<pallas_src>
import jax
import jax.numpy as jnp
from jax import lax
from jax.experimental import pallas as pl
from jax.experimental.pallas import tpu as pltpu

# ---- module hyper-parameters (PyTorch defaults: expansion=4, growthRate=32) ----
INPLANES = 32
EXPANSION = 4
GROWTH = 32
PLANES = EXPANSION * GROWTH          # 128
OUTPLANES = INPLANES + GROWTH        # 64
SE_HIDDEN = OUTPLANES // 16          # 4
N, H, W = 2, 8, 8                    # whole batch in one grid step: M = 128 rows
EPS = 1e-5
HI = jax.lax.Precision.HIGHEST       # reference only


def _shift1(y, d, axis):
    """z[..., i, ...] = y[..., i+d, ...]; zero where i+d is out of range (|d| <= 1)."""
    if d == 0:
        return y
    size = y.shape[axis]
    zshape = list(y.shape)
    zshape[axis] = 1
    zeros = jnp.zeros(zshape, y.dtype)
    idx = [slice(None)] * y.ndim
    if d > 0:
        idx[axis] = slice(d, size)
        return jnp.concatenate([y[tuple(idx)], zeros], axis=axis)
    idx[axis] = slice(0, size + d)
    return jnp.concatenate([zeros, y[tuple(idx)]], axis=axis)


def se_dense_bottleneck_kernel(
    x_ref,       # (NB, H, W, INPLANES)    f32  NHWC input block
    scale1_ref,  # (1, INPLANES)           f32  bn1 folded scale
    shift1_ref,  # (1, INPLANES)           f32  bn1 folded shift
    w1_ref,      # (INPLANES, PLANES)      bf16 1x1 conv weight (bn2 scale folded in)
    shift2_ref,  # (1, PLANES)             f32  bn2 folded shift (conv1 bias)
    w2_ref,      # (9, PLANES, GROWTH)     bf16 3x3 conv weight, tap = ky*3+kx
    fc1wx_ref,   # (INPLANES, SE_HIDDEN)   f32  SE fc1, rows for the x slab
    fc1wc_ref,   # (GROWTH, SE_HIDDEN)     f32  SE fc1, rows for the conv slab
    fc1b_ref,    # (1, SE_HIDDEN)          f32
    fc2wx_ref,   # (SE_HIDDEN, INPLANES)   f32  SE fc2, columns for the x slab
    fc2wc_ref,   # (SE_HIDDEN, GROWTH)     f32  SE fc2, columns for the conv slab
    fc2bx_ref,   # (1, INPLANES)           f32
    fc2bc_ref,   # (1, GROWTH)             f32
    o_ref,       # (NB, H, W, OUTPLANES)   f32  output block
):
    nb, hh, ww, _ = x_ref.shape
    m = nb * hh * ww

    x4 = x_ref[...]                                      # f32, kept exact for passthrough
    x = x4.reshape(m, INPLANES)

    # bn1 (folded affine) + relu  (VPU)
    h = jnp.maximum(x * scale1_ref[...] + shift1_ref[...], 0.0)

    # conv1 (1x1) with bn2 scale folded into columns; bf16 operands, f32 accumulation.
    y1 = jnp.dot(h.astype(jnp.bfloat16), w1_ref[...],
                 preferred_element_type=jnp.float32)
    # bn2 shift + relu, then a single narrow f32->bf16 cast reused by all 9 taps.
    y2b = jnp.maximum(y1 + shift2_ref[...], 0.0).astype(jnp.bfloat16)   # (m, PLANES)

    # conv2 (3x3, SAME zero padding): 9 accumulating per-tap matmuls.  The shift /
    # zero-border select runs on the (m, GROWTH) tap RESULT, not the 128-wide input.
    conv = jnp.zeros((nb, hh, ww, GROWTH), jnp.float32)
    for ky in range(3):
        for kx in range(3):
            t = jnp.dot(y2b, w2_ref[ky * 3 + kx],
                        preferred_element_type=jnp.float32)             # (m, GROWTH)
            t4 = _shift1(_shift1(t.reshape(nb, hh, ww, GROWTH), ky - 1, axis=1),
                         kx - 1, axis=2)
            conv = conv + t4

    # TODO(synk): dropout not implemented (dropRate=0 is the module default).

    # Squeeze-excite.  The (m, 64) `cat` is never materialized: pool each slab and
    # use a pre-split fc1 weight, so x stays exact f32 and no lane concat is needed.
    inv_hw = 1.0 / float(hh * ww)
    pooled_x = jnp.sum(x4, axis=(1, 2)) * inv_hw                         # (nb, INPLANES)
    pooled_c = jnp.sum(conv, axis=(1, 2)) * inv_hw                       # (nb, GROWTH)
    s1 = jnp.maximum(
        jnp.dot(pooled_x, fc1wx_ref[...], preferred_element_type=jnp.float32)
        + jnp.dot(pooled_c, fc1wc_ref[...], preferred_element_type=jnp.float32)
        + fc1b_ref[...], 0.0)                                            # (nb, SE_HIDDEN)
    se_x = 1.0 / (1.0 + jnp.exp(
        -(jnp.dot(s1, fc2wx_ref[...], preferred_element_type=jnp.float32)
          + fc2bx_ref[...])))                                            # (nb, INPLANES)
    se_c = 1.0 / (1.0 + jnp.exp(
        -(jnp.dot(s1, fc2wc_ref[...], preferred_element_type=jnp.float32)
          + fc2bc_ref[...])))                                            # (nb, GROWTH)

    # Channel-wise rescale of [x | conv]; single 64-lane store of the fused result.
    out_x = x4 * se_x[:, None, None, :]
    out_c = conv * se_c[:, None, None, :]
    o_ref[...] = jnp.concatenate([out_x, out_c], axis=-1).astype(o_ref.dtype)


def se_dense_bottleneck_nhwc(x_nhwc, kp, *, batch_block=None):
    """Core NHWC entry point: (N, H, W, INPLANES) -> (N, H, W, OUTPLANES).

    batch_block: batches per grid step (default: whole batch -> grid=(1,)).  With
    larger batches, choose batch_block so each step has >= 256 rows and the
    "parallel" grid axis shards across v7x's two TensorCores."""
    n, hh, ww, cin = x_nhwc.shape
    assert cin == INPLANES
    nb = n if batch_block is None else batch_block
    assert n % nb == 0
    grid = (n // nb,)
    full2 = lambda i: (0, 0)
    full3 = lambda i: (0, 0, 0)

    return pl.pallas_call(
        se_dense_bottleneck_kernel,
        out_shape=jax.ShapeDtypeStruct((n, hh, ww, OUTPLANES), jnp.float32),
        grid_spec=pltpu.PrefetchScalarGridSpec(
            num_scalar_prefetch=0,
            grid=grid,
            in_specs=[
                pl.BlockSpec((nb, hh, ww, INPLANES), lambda i: (i, 0, 0, 0)),
                pl.BlockSpec((1, INPLANES), full2),
                pl.BlockSpec((1, INPLANES), full2),
                pl.BlockSpec((INPLANES, PLANES), full2),
                pl.BlockSpec((1, PLANES), full2),
                pl.BlockSpec((9, PLANES, GROWTH), full3),
                pl.BlockSpec((INPLANES, SE_HIDDEN), full2),
                pl.BlockSpec((GROWTH, SE_HIDDEN), full2),
                pl.BlockSpec((1, SE_HIDDEN), full2),
                pl.BlockSpec((SE_HIDDEN, INPLANES), full2),
                pl.BlockSpec((SE_HIDDEN, GROWTH), full2),
                pl.BlockSpec((1, INPLANES), full2),
                pl.BlockSpec((1, GROWTH), full2),
            ],
            out_specs=pl.BlockSpec((nb, hh, ww, OUTPLANES), lambda i: (i, 0, 0, 0)),
        ),
        compiler_params=pltpu.CompilerParams(dimension_semantics=("parallel",)),
    )(x_nhwc,
      kp["scale1"], kp["shift1"], kp["w1_k"], kp["shift2"], kp["w2_k"],
      kp["fc1wx_k"], kp["fc1wc_k"], kp["fc1b_k"],
      kp["fc2wx_k"], kp["fc2wc_k"], kp["fc2bx_k"], kp["fc2bc_k"])


def se_dense_bottleneck(x_nchw, kp):
    """PyTorch-facing NCHW interface (interface parity only).  Real channels-last
    pipelines should call se_dense_bottleneck_nhwc directly and skip both
    transposes (each is an HBM round trip of the same order as the kernel)."""
    x = jnp.transpose(x_nchw, (0, 2, 3, 1))
    return jnp.transpose(se_dense_bottleneck_nhwc(x, kp), (0, 3, 1, 2))


# ---------------------- parameter construction (glue, plain JAX) ----------------------
def make_params(key):
    ks = jax.random.split(key, 12)
    p = {
        # BatchNorm1 (eval mode: gamma, beta, running mean/var)
        "gamma1": 1.0 + 0.1 * jax.random.normal(ks[0], (INPLANES,), jnp.float32),
        "beta1": 0.1 * jax.random.normal(ks[1], (INPLANES,), jnp.float32),
        "mean1": 0.1 * jax.random.normal(ks[2], (INPLANES,), jnp.float32),
        "var1": 1.0 + 0.1 * jax.random.uniform(ks[3], (INPLANES,), jnp.float32),
        # conv1: OIHW (PLANES, INPLANES, 1, 1) -- kept as (PLANES, INPLANES)
        "w1": 0.1 * jax.random.normal(ks[4], (PLANES, INPLANES), jnp.float32),
        # BatchNorm2
        "gamma2": 1.0 + 0.1 * jax.random.normal(ks[5], (PLANES,), jnp.float32),
        "beta2": 0.1 * jax.random.normal(ks[6], (PLANES,), jnp.float32),
        "mean2": 0.1 * jax.random.normal(ks[7], (PLANES,), jnp.float32),
        "var2": 1.0 + 0.1 * jax.random.uniform(ks[8], (PLANES,), jnp.float32),
        # conv2: OIHW (GROWTH, PLANES, 3, 3)
        "w2": 0.05 * jax.random.normal(ks[9], (GROWTH, PLANES, 3, 3), jnp.float32),
        # SE fc layers (PyTorch Linear convention: (out, in) weight + bias)
        "fc1w": 0.1 * jax.random.normal(ks[10], (SE_HIDDEN, OUTPLANES), jnp.float32),
        "fc1b": jnp.zeros((SE_HIDDEN,), jnp.float32),
        "fc2w": 0.1 * jax.random.normal(ks[11], (OUTPLANES, SE_HIDDEN), jnp.float32),
        "fc2b": jnp.zeros((OUTPLANES,), jnp.float32),
    }
    # Fold BN into scale/shift; fold bn2 into conv1; pre-lay-out / pre-split weights.
    scale1 = p["gamma1"] / jnp.sqrt(p["var1"] + EPS)
    scale2 = p["gamma2"] / jnp.sqrt(p["var2"] + EPS)
    # (3,3,cin,cout) -> (9, PLANES, GROWTH), tap index = ky*3+kx
    w2_taps = jnp.transpose(p["w2"], (2, 3, 1, 0)).reshape(9, PLANES, GROWTH)
    fc1w_t = p["fc1w"].T                               # (OUTPLANES, SE_HIDDEN)
    fc2w_t = p["fc2w"].T                               # (SE_HIDDEN, OUTPLANES)
    kp = {
        "scale1": scale1[None, :],
        "shift1": (p["beta1"] - p["mean1"] * scale1)[None, :],
        # (INPLANES, PLANES), bn2 scale folded into columns, bf16 for the MXU
        "w1_k": (p["w1"].T * scale2[None, :]).astype(jnp.bfloat16),
        "shift2": (p["beta2"] - p["mean2"] * scale2)[None, :],
        "w2_k": w2_taps.astype(jnp.bfloat16),
        "fc1wx_k": fc1w_t[:INPLANES],                  # (INPLANES, SE_HIDDEN)
        "fc1wc_k": fc1w_t[INPLANES:],                  # (GROWTH, SE_HIDDEN)
        "fc1b_k": p["fc1b"][None, :],
        "fc2wx_k": fc2w_t[:, :INPLANES],               # (SE_HIDDEN, INPLANES)
        "fc2wc_k": fc2w_t[:, INPLANES:],               # (SE_HIDDEN, GROWTH)
        "fc2bx_k": p["fc2b"][:INPLANES][None, :],
        "fc2bc_k": p["fc2b"][INPLANES:][None, :],
    }
    return p, kp


# ---------------------- pure-JAX reference (NCHW, mirrors the PyTorch forward) --------
def reference(x, p):
    s1 = p["gamma1"] / jnp.sqrt(p["var1"] + EPS)
    b1 = p["beta1"] - p["mean1"] * s1
    h = jnp.maximum(x * s1[None, :, None, None] + b1[None, :, None, None], 0.0)
    y1 = jnp.einsum("nchw,oc->nohw", h, p["w1"], precision=HI)
    s2 = p["gamma2"] / jnp.sqrt(p["var2"] + EPS)
    b2 = p["beta2"] - p["mean2"] * s2
    y2 = jnp.maximum(y1 * s2[None, :, None, None] + b2[None, :, None, None], 0.0)
    y3 = lax.conv_general_dilated(
        y2, p["w2"], window_strides=(1, 1), padding="SAME",
        dimension_numbers=("NCHW", "OIHW", "NCHW"), precision=HI)
    cat = jnp.concatenate([x, y3], axis=1)
    se = jnp.mean(cat, axis=(2, 3))
    z1 = jnp.maximum(se @ p["fc1w"].T + p["fc1b"], 0.0)
    z2 = jax.nn.sigmoid(z1 @ p["fc2w"].T + p["fc2b"])
    return cat * z2[:, :, None, None]


if __name__ == "__main__":
    key = jax.random.PRNGKey(0)
    kx, kp_key = jax.random.split(key)
    x_nchw = jax.random.normal(kx, (N, INPLANES, H, W), jnp.float32)
    p, kp = make_params(kp_key)

    # Drive the NHWC entry directly (the integration point); the transpose below is
    # setup-time glue for comparing against the NCHW PyTorch-style reference.
    x_nhwc = jnp.transpose(x_nchw, (0, 2, 3, 1))
    out_nhwc = jax.block_until_ready(se_dense_bottleneck_nhwc(x_nhwc, kp))

    ref_nhwc = jax.block_until_ready(
        jnp.transpose(reference(x_nchw, p), (0, 2, 3, 1)))

    assert out_nhwc.shape == (N, H, W, OUTPLANES), out_nhwc.shape
    # Tolerance sized for bf16-operand MXU matmuls vs. an f32 HIGHEST-precision
    # reference (observed diffs are ~1e-3..1e-2; structural bugs would be >1e-1).
    max_err = float(jnp.max(jnp.abs(out_nhwc - ref_nhwc)))
    assert jnp.allclose(out_nhwc, ref_nhwc, rtol=3e-2, atol=3e-2), max_err
    print("KERNEL_OK")
</pallas_src>

<mosaic_0001>
module attributes {stable_mosaic.version = 11 : i64} {
  func.func @se_dense_bottleneck_kernel(%arg0: i32, %arg1: memref<2x8x8x32xf32, #tpu.memory_space<vmem>>, %arg2: memref<1x32xf32, #tpu.memory_space<vmem>>, %arg3: memref<1x32xf32, #tpu.memory_space<vmem>>, %arg4: memref<32x128xbf16, #tpu.memory_space<vmem>>, %arg5: memref<1x128xf32, #tpu.memory_space<vmem>>, %arg6: memref<9x128x32xbf16, #tpu.memory_space<vmem>>, %arg7: memref<32x4xf32, #tpu.memory_space<vmem>>, %arg8: memref<32x4xf32, #tpu.memory_space<vmem>>, %arg9: memref<1x4xf32, #tpu.memory_space<vmem>>, %arg10: memref<4x32xf32, #tpu.memory_space<vmem>>, %arg11: memref<4x32xf32, #tpu.memory_space<vmem>>, %arg12: memref<1x32xf32, #tpu.memory_space<vmem>>, %arg13: memref<1x32xf32, #tpu.memory_space<vmem>>, %arg14: memref<2x8x8x64xf32, #tpu.memory_space<vmem>>) attributes {dimension_semantics = [#tpu.dimension_semantics<parallel>], iteration_bounds = array<i64: 1>, scalar_prefetch = 0 : i64, scratch_operands = 0 : i64, tpu.core_type = #tpu.core_type<tc>, window_params = [{transform_indices = @transform_0, window_bounds = array<i64: 2, 8, 8, 32>}, {pipeline_mode = #tpu.pipeline_mode<synchronous>, transform_indices = @transform_1, window_bounds = array<i64: 1, 32>}, {pipeline_mode = #tpu.pipeline_mode<synchronous>, transform_indices = @transform_2, window_bounds = array<i64: 1, 32>}, {pipeline_mode = #tpu.pipeline_mode<synchronous>, transform_indices = @transform_3, window_bounds = array<i64: 32, 128>}, {pipeline_mode = #tpu.pipeline_mode<synchronous>, transform_indices = @transform_4, window_bounds = array<i64: 1, 128>}, {pipeline_mode = #tpu.pipeline_mode<synchronous>, transform_indices = @transform_5, window_bounds = array<i64: 9, 128, 32>}, {pipeline_mode = #tpu.pipeline_mode<synchronous>, transform_indices = @transform_6, window_bounds = array<i64: 32, 4>}, {pipeline_mode = #tpu.pipeline_mode<synchronous>, transform_indices = @transform_7, window_bounds = array<i64: 32, 4>}, {pipeline_mode = #tpu.pipeline_mode<synchronous>, transform_indices = @transform_8, window_bounds = array<i64: 1, 4>}, {pipeline_mode = #tpu.pipeline_mode<synchronous>, transform_indices = @transform_9, window_bounds = array<i64: 4, 32>}, {pipeline_mode = #tpu.pipeline_mode<synchronous>, transform_indices = @transform_10, window_bounds = array<i64: 4, 32>}, {pipeline_mode = #tpu.pipeline_mode<synchronous>, transform_indices = @transform_11, window_bounds = array<i64: 1, 32>}, {pipeline_mode = #tpu.pipeline_mode<synchronous>, transform_indices = @transform_12, window_bounds = array<i64: 1, 32>}, {transform_indices = @transform_13, window_bounds = array<i64: 2, 8, 8, 64>}]} {
    %c0 = arith.constant 0 : index
    %c0_0 = arith.constant 0 : index
    %c0_1 = arith.constant 0 : index
    %c0_2 = arith.constant 0 : index
    %0 = vector.load %arg1[%c0, %c0_0, %c0_1, %c0_2] : memref<2x8x8x32xf32, #tpu.memory_space<vmem>>, vector<2x8x8x32xf32>
    %1 = vector.shape_cast %0 : vector<2x8x8x32xf32> to vector<128x32xf32>
    %c0_3 = arith.constant 0 : index
    %c0_4 = arith.constant 0 : index
    %2 = vector.load %arg2[%c0_3, %c0_4] : memref<1x32xf32, #tpu.memory_space<vmem>>, vector<1x32xf32>
    %3 = vector.broadcast %2 : vector<1x32xf32> to vector<128x32xf32>
    %4 = arith.mulf %1, %3 : vector<128x32xf32>
    %c0_5 = arith.constant 0 : index
    %c0_6 = arith.constant 0 : index
    %5 = vector.load %arg3[%c0_5, %c0_6] : memref<1x32xf32, #tpu.memory_space<vmem>>, vector<1x32xf32>
    %6 = vector.broadcast %5 : vector<1x32xf32> to vector<128x32xf32>
    %7 = arith.addf %4, %6 : vector<128x32xf32>
    %cst = arith.constant 0.000000e+00 : f32
    %8 = vector.broadcast %cst : f32 to vector<128x32xf32>
    %9 = arith.maximumf %7, %8 : vector<128x32xf32>
    %10 = arith.truncf %9 : vector<128x32xf32> to vector<128x32xbf16>
    %c0_7 = arith.constant 0 : index
    %c0_8 = arith.constant 0 : index
    %11 = vector.load %arg4[%c0_7, %c0_8] : memref<32x128xbf16, #tpu.memory_space<vmem>>, vector<32x128xbf16>
    %cst_9 = arith.constant dense<0.000000e+00> : vector<128x128xf32>
    %12 = tpu.matmul %10, %11, %cst_9 {dimension_numbers = #tpu.dot_dimension_numbers<[1], [0], [0], [1], [0, 0, 1, 1], [], []>} : vector<128x32xbf16>, vector<32x128xbf16>, vector<128x128xf32> -> vector<128x128xf32>
    %c0_10 = arith.constant 0 : index
    %c0_11 = arith.constant 0 : index
    %13 = vector.load %arg5[%c0_10, %c0_11] : memref<1x128xf32, #tpu.memory_space<vmem>>, vector<1x128xf32>
    %14 = vector.broadcast %13 : vector<1x128xf32> to vector<128x128xf32>
    %15 = arith.addf %12, %14 : vector<128x128xf32>
    %cst_12 = arith.constant 0.000000e+00 : f32
    %16 = vector.broadcast %cst_12 : f32 to vector<128x128xf32>
    %17 = arith.maximumf %15, %16 : vector<128x128xf32>
    %18 = arith.truncf %17 : vector<128x128xf32> to vector<128x128xbf16>
    %cst_13 = arith.constant 0.000000e+00 : f32
    %19 = vector.broadcast %cst_13 : f32 to vector<2x8x8x32xf32>
    %c0_14 = arith.constant 0 : index
    %c0_15 = arith.constant 0 : index
    %c0_16 = arith.constant 0 : index
    %20 = vector.load %arg6[%c0_14, %c0_15, %c0_16] : memref<9x128x32xbf16, #tpu.memory_space<vmem>>, vector<1x128x32xbf16>
    %21 = vector.shape_cast %20 : vector<1x128x32xbf16> to vector<128x32xbf16>
    %cst_17 = arith.constant dense<0.000000e+00> : vector<128x32xf32>
    %22 = tpu.matmul %18, %21, %cst_17 {dimension_numbers = #tpu.dot_dimension_numbers<[1], [0], [0], [1], [0, 0, 1, 1], [], []>} : vector<128x128xbf16>, vector<128x32xbf16>, vector<128x32xf32> -> vector<128x32xf32>
    %23 = vector.shape_cast %22 : vector<128x32xf32> to vector<2x8x8x32xf32>
    %cst_18 = arith.constant 0.000000e+00 : f32
    %24 = vector.broadcast %cst_18 : f32 to vector<2x1x8x32xf32>
    %25 = vector.extract_strided_slice %23 {offsets = [0, 0, 0, 0], sizes = [2, 7, 8, 32], strides = [1, 1, 1, 1]} : vector<2x8x8x32xf32> to vector<2x7x8x32xf32>
    %26 = tpu.concatenate %24, %25 in 1 : vector<2x1x8x32xf32>, vector<2x7x8x32xf32> -> vector<2x8x8x32xf32>
    %cst_19 = arith.constant 0.000000e+00 : f32
    %27 = vector.broadcast %cst_19 : f32 to vector<2x8x1x32xf32>
    %28 = vector.extract_strided_slice %26 {offsets = [0, 0, 0, 0], sizes = [2, 8, 7, 32], strides = [1, 1, 1, 1]} : vector<2x8x8x32xf32> to vector<2x8x7x32xf32>
    %29 = tpu.concatenate %27, %28 in 2 : vector<2x8x1x32xf32>, vector<2x8x7x32xf32> -> vector<2x8x8x32xf32>
    %30 = arith.addf %19, %29 : vector<2x8x8x32xf32>
    %c1 = arith.constant 1 : index
    %c0_20 = arith.constant 0 : index
    %c0_21 = arith.constant 0 : index
    %31 = vector.load %arg6[%c1, %c0_20, %c0_21] : memref<9x128x32xbf16, #tpu.memory_space<vmem>>, vector<1x128x32xbf16>
    %32 = vector.shape_cast %31 : vector<1x128x32xbf16> to vector<128x32xbf16>
    %cst_22 = arith.constant dense<0.000000e+00> : vector<128x32xf32>
    %33 = tpu.matmul %18, %32, %cst_22 {dimension_numbers = #tpu.dot_dimension_numbers<[1], [0], [0], [1], [0, 0, 1, 1], [], []>} : vector<128x128xbf16>, vector<128x32xbf16>, vector<128x32xf32> -> vector<128x32xf32>
    %34 = vector.shape_cast %33 : vector<128x32xf32> to vector<2x8x8x32xf32>
    %cst_23 = arith.constant 0.000000e+00 : f32
    %35 = vector.broadcast %cst_23 : f32 to vector<2x1x8x32xf32>
    %36 = vector.extract_strided_slice %34 {offsets = [0, 0, 0, 0], sizes = [2, 7, 8, 32], strides = [1, 1, 1, 1]} : vector<2x8x8x32xf32> to vector<2x7x8x32xf32>
    %37 = tpu.concatenate %35, %36 in 1 : vector<2x1x8x32xf32>, vector<2x7x8x32xf32> -> vector<2x8x8x32xf32>
    %38 = arith.addf %30, %37 : vector<2x8x8x32xf32>
    %c2 = arith.constant 2 : index
    %c0_24 = arith.constant 0 : index
    %c0_25 = arith.constant 0 : index
    %39 = vector.load %arg6[%c2, %c0_24, %c0_25] : memref<9x128x32xbf16, #tpu.memory_space<vmem>>, vector<1x128x32xbf16>
    %40 = vector.shape_cast %39 : vector<1x128x32xbf16> to vector<128x32xbf16>
    %cst_26 = arith.constant dense<0.000000e+00> : vector<128x32xf32>
    %41 = tpu.matmul %18, %40, %cst_26 {dimension_numbers = #tpu.dot_dimension_numbers<[1], [0], [0], [1], [0, 0, 1, 1], [], []>} : vector<128x128xbf16>, vector<128x32xbf16>, vector<128x32xf32> -> vector<128x32xf32>
    %42 = vector.shape_cast %41 : vector<128x32xf32> to vector<2x8x8x32xf32>
    %cst_27 = arith.constant 0.000000e+00 : f32
    %43 = vector.broadcast %cst_27 : f32 to vector<2x1x8x32xf32>
    %44 = vector.extract_strided_slice %42 {offsets = [0, 0, 0, 0], sizes = [2, 7, 8, 32], strides = [1, 1, 1, 1]} : vector<2x8x8x32xf32> to vector<2x7x8x32xf32>
    %45 = tpu.concatenate %43, %44 in 1 : vector<2x1x8x32xf32>, vector<2x7x8x32xf32> -> vector<2x8x8x32xf32>
    %cst_28 = arith.constant 0.000000e+00 : f32
    %46 = vector.broadcast %cst_28 : f32 to vector<2x8x1x32xf32>
    %47 = vector.extract_strided_slice %45 {offsets = [0, 0, 1, 0], sizes = [2, 8, 7, 32], strides = [1, 1, 1, 1]} : vector<2x8x8x32xf32> to vector<2x8x7x32xf32>
    %48 = tpu.concatenate %47, %46 in 2 : vector<2x8x7x32xf32>, vector<2x8x1x32xf32> -> vector<2x8x8x32xf32>
    %49 = arith.addf %38, %48 : vector<2x8x8x32xf32>
    %c3 = arith.constant 3 : index
    %c0_29 = arith.constant 0 : index
    %c0_30 = arith.constant 0 : index
    %50 = vector.load %arg6[%c3, %c0_29, %c0_30] : memref<9x128x32xbf16, #tpu.memory_space<vmem>>, vector<1x128x32xbf16>
    %51 = vector.shape_cast %50 : vector<1x128x32xbf16> to vector<128x32xbf16>
    %cst_31 = arith.constant dense<0.000000e+00> : vector<128x32xf32>
    %52 = tpu.matmul %18, %51, %cst_31 {dimension_numbers = #tpu.dot_dimension_numbers<[1], [0], [0], [1], [0, 0, 1, 1], [], []>} : vector<128x128xbf16>, vector<128x32xbf16>, vector<128x32xf32> -> vector<128x32xf32>
    %53 = vector.shape_cast %52 : vector<128x32xf32> to vector<2x8x8x32xf32>
    %cst_32 = arith.constant 0.000000e+00 : f32
    %54 = vector.broadcast %cst_32 : f32 to vector<2x8x1x32xf32>
    %55 = vector.extract_strided_slice %53 {offsets = [0, 0, 0, 0], sizes = [2, 8, 7, 32], strides = [1, 1, 1, 1]} : vector<2x8x8x32xf32> to vector<2x8x7x32xf32>
    %56 = tpu.concatenate %54, %55 in 2 : vector<2x8x1x32xf32>, vector<2x8x7x32xf32> -> vector<2x8x8x32xf32>
    %57 = arith.addf %49, %56 : vector<2x8x8x32xf32>
    %c4 = arith.constant 4 : index
    %c0_33 = arith.constant 0 : index
    %c0_34 = arith.constant 0 : index
    %58 = vector.load %arg6[%c4, %c0_33, %c0_34] : memref<9x128x32xbf16, #tpu.memory_space<vmem>>, vector<1x128x32xbf16>
    %59 = vector.shape_cast %58 : vector<1x128x32xbf16> to vector<128x32xbf16>
    %cst_35 = arith.constant dense<0.000000e+00> : vector<128x32xf32>
    %60 = tpu.matmul %18, %59, %cst_35 {dimension_numbers = #tpu.dot_dimension_numbers<[1], [0], [0], [1], [0, 0, 1, 1], [], []>} : vector<128x128xbf16>, vector<128x32xbf16>, vector<128x32xf32> -> vector<128x32xf32>
    %61 = vector.shape_cast %60 : vector<128x32xf32> to vector<2x8x8x32xf32>
    %62 = arith.addf %57, %61 : vector<2x8x8x32xf32>
    %c5 = arith.constant 5 : index
    %c0_36 = arith.constant 0 : index
    %c0_37 = arith.constant 0 : index
    %63 = vector.load %arg6[%c5, %c0_36, %c0_37] : memref<9x128x32xbf16, #tpu.memory_space<vmem>>, vector<1x128x32xbf16>
    %64 = vector.shape_cast %63 : vector<1x128x32xbf16> to vector<128x32xbf16>
    %cst_38 = arith.constant dense<0.000000e+00> : vector<128x32xf32>
    %65 = tpu.matmul %18, %64, %cst_38 {dimension_numbers = #tpu.dot_dimension_numbers<[1], [0], [0], [1], [0, 0, 1, 1], [], []>} : vector<128x128xbf16>, vector<128x32xbf16>, vector<128x32xf32> -> vector<128x32xf32>
    %66 = vector.shape_cast %65 : vector<128x32xf32> to vector<2x8x8x32xf32>
    %cst_39 = arith.constant 0.000000e+00 : f32
    %67 = vector.broadcast %cst_39 : f32 to vector<2x8x1x32xf32>
    %68 = vector.extract_strided_slice %66 {offsets = [0, 0, 1, 0], sizes = [2, 8, 7, 32], strides = [1, 1, 1, 1]} : vector<2x8x8x32xf32> to vector<2x8x7x32xf32>
    %69 = tpu.concatenate %68, %67 in 2 : vector<2x8x7x32xf32>, vector<2x8x1x32xf32> -> vector<2x8x8x32xf32>
    %70 = arith.addf %62, %69 : vector<2x8x8x32xf32>
    %c6 = arith.constant 6 : index
    %c0_40 = arith.constant 0 : index
    %c0_41 = arith.constant 0 : index
    %71 = vector.load %arg6[%c6, %c0_40, %c0_41] : memref<9x128x32xbf16, #tpu.memory_space<vmem>>, vector<1x128x32xbf16>
    %72 = vector.shape_cast %71 : vector<1x128x32xbf16> to vector<128x32xbf16>
    %cst_42 = arith.constant dense<0.000000e+00> : vector<128x32xf32>
    %73 = tpu.matmul %18, %72, %cst_42 {dimension_numbers = #tpu.dot_dimension_numbers<[1], [0], [0], [1], [0, 0, 1, 1], [], []>} : vector<128x128xbf16>, vector<128x32xbf16>, vector<128x32xf32> -> vector<128x32xf32>
    %74 = vector.shape_cast %73 : vector<128x32xf32> to vector<2x8x8x32xf32>
    %cst_43 = arith.constant 0.000000e+00 : f32
    %75 = vector.broadcast %cst_43 : f32 to vector<2x1x8x32xf32>
    %76 = vector.extract_strided_slice %74 {offsets = [0, 1, 0, 0], sizes = [2, 7, 8, 32], strides = [1, 1, 1, 1]} : vector<2x8x8x32xf32> to vector<2x7x8x32xf32>
    %77 = tpu.concatenate %76, %75 in 1 : vector<2x7x8x32xf32>, vector<2x1x8x32xf32> -> vector<2x8x8x32xf32>
    %cst_44 = arith.constant 0.000000e+00 : f32
    %78 = vector.broadcast %cst_44 : f32 to vector<2x8x1x32xf32>
    %79 = vector.extract_strided_slice %77 {offsets = [0, 0, 0, 0], sizes = [2, 8, 7, 32], strides = [1, 1, 1, 1]} : vector<2x8x8x32xf32> to vector<2x8x7x32xf32>
    %80 = tpu.concatenate %78, %79 in 2 : vector<2x8x1x32xf32>, vector<2x8x7x32xf32> -> vector<2x8x8x32xf32>
    %81 = arith.addf %70, %80 : vector<2x8x8x32xf32>
    %c7 = arith.constant 7 : index
    %c0_45 = arith.constant 0 : index
    %c0_46 = arith.constant 0 : index
    %82 = vector.load %arg6[%c7, %c0_45, %c0_46] : memref<9x128x32xbf16, #tpu.memory_space<vmem>>, vector<1x128x32xbf16>
    %83 = vector.shape_cast %82 : vector<1x128x32xbf16> to vector<128x32xbf16>
    %cst_47 = arith.constant dense<0.000000e+00> : vector<128x32xf32>
    %84 = tpu.matmul %18, %83, %cst_47 {dimension_numbers = #tpu.dot_dimension_numbers<[1], [0], [0], [1], [0, 0, 1, 1], [], []>} : vector<128x128xbf16>, vector<128x32xbf16>, vector<128x32xf32> -> vector<128x32xf32>
    %85 = vector.shape_cast %84 : vector<128x32xf32> to vector<2x8x8x32xf32>
    %cst_48 = arith.constant 0.000000e+00 : f32
    %86 = vector.broadcast %cst_48 : f32 to vector<2x1x8x32xf32>
    %87 = vector.extract_strided_slice %85 {offsets = [0, 1, 0, 0], sizes = [2, 7, 8, 32], strides = [1, 1, 1, 1]} : vector<2x8x8x32xf32> to vector<2x7x8x32xf32>
    %88 = tpu.concatenate %87, %86 in 1 : vector<2x7x8x32xf32>, vector<2x1x8x32xf32> -> vector<2x8x8x32xf32>
    %89 = arith.addf %81, %88 : vector<2x8x8x32xf32>
    %c8 = arith.constant 8 : index
    %c0_49 = arith.constant 0 : index
    %c0_50 = arith.constant 0 : index
    %90 = vector.load %arg6[%c8, %c0_49, %c0_50] : memref<9x128x32xbf16, #tpu.memory_space<vmem>>, vector<1x128x32xbf16>
    %91 = vector.shape_cast %90 : vector<1x128x32xbf16> to vector<128x32xbf16>
    %cst_51 = arith.constant dense<0.000000e+00> : vector<128x32xf32>
    %92 = tpu.matmul %18, %91, %cst_51 {dimension_numbers = #tpu.dot_dimension_numbers<[1], [0], [0], [1], [0, 0, 1, 1], [], []>} : vector<128x128xbf16>, vector<128x32xbf16>, vector<128x32xf32> -> vector<128x32xf32>
    %93 = vector.shape_cast %92 : vector<128x32xf32> to vector<2x8x8x32xf32>
    %cst_52 = arith.constant 0.000000e+00 : f32
    %94 = vector.broadcast %cst_52 : f32 to vector<2x1x8x32xf32>
    %95 = vector.extract_strided_slice %93 {offsets = [0, 1, 0, 0], sizes = [2, 7, 8, 32], strides = [1, 1, 1, 1]} : vector<2x8x8x32xf32> to vector<2x7x8x32xf32>
    %96 = tpu.concatenate %95, %94 in 1 : vector<2x7x8x32xf32>, vector<2x1x8x32xf32> -> vector<2x8x8x32xf32>
    %cst_53 = arith.constant 0.000000e+00 : f32
    %97 = vector.broadcast %cst_53 : f32 to vector<2x8x1x32xf32>
    %98 = vector.extract_strided_slice %96 {offsets = [0, 0, 1, 0], sizes = [2, 8, 7, 32], strides = [1, 1, 1, 1]} : vector<2x8x8x32xf32> to vector<2x8x7x32xf32>
    %99 = tpu.concatenate %98, %97 in 2 : vector<2x8x7x32xf32>, vector<2x8x1x32xf32> -> vector<2x8x8x32xf32>
    %100 = arith.addf %89, %99 : vector<2x8x8x32xf32>
    %cst_54 = arith.constant dense<0.000000e+00> : vector<2x32xf32>
    %101 = vector.multi_reduction <add>, %0, %cst_54 [1, 2] : vector<2x8x8x32xf32> to vector<2x32xf32>
    %cst_55 = arith.constant 1.562500e-02 : f32
    %102 = vector.broadcast %cst_55 : f32 to vector<2x32xf32>
    %103 = arith.mulf %101, %102 : vector<2x32xf32>
    %cst_56 = arith.constant dense<0.000000e+00> : vector<2x32xf32>
    %104 = vector.multi_reduction <add>, %100, %cst_56 [1, 2] : vector<2x8x8x32xf32> to vector<2x32xf32>
    %cst_57 = arith.constant 1.562500e-02 : f32
    %105 = vector.broadcast %cst_57 : f32 to vector<2x32xf32>
    %106 = arith.mulf %104, %105 : vector<2x32xf32>
    %c0_58 = arith.constant 0 : index
    %c0_59 = arith.constant 0 : index
    %107 = vector.load %arg7[%c0_58, %c0_59] : memref<32x4xf32, #tpu.memory_space<vmem>>, vector<32x4xf32>
    %cst_60 = arith.constant dense<0.000000e+00> : vector<2x4xf32>
    %108 = tpu.matmul %103, %107, %cst_60 {dimension_numbers = #tpu.dot_dimension_numbers<[1], [0], [0], [1], [0, 0, 1, 1], [], []>} : vector<2x32xf32>, vector<32x4xf32>, vector<2x4xf32> -> vector<2x4xf32>
    %c0_61 = arith.constant 0 : index
    %c0_62 = arith.constant 0 : index
    %109 = vector.load %arg8[%c0_61, %c0_62] : memref<32x4xf32, #tpu.memory_space<vmem>>, vector<32x4xf32>
    %cst_63 = arith.constant dense<0.000000e+00> : vector<2x4xf32>
    %110 = tpu.matmul %106, %109, %cst_63 {dimension_numbers = #tpu.dot_dimension_numbers<[1], [0], [0], [1], [0, 0, 1, 1], [], []>} : vector<2x32xf32>, vector<32x4xf32>, vector<2x4xf32> -> vector<2x4xf32>
    %111 = arith.addf %108, %110 : vector<2x4xf32>
    %c0_64 = arith.constant 0 : index
    %c0_65 = arith.constant 0 : index
    %112 = vector.load %arg9[%c0_64, %c0_65] : memref<1x4xf32, #tpu.memory_space<vmem>>, vector<1x4xf32>
    %113 = vector.broadcast %112 : vector<1x4xf32> to vector<2x4xf32>
    %114 = arith.addf %111, %113 : vector<2x4xf32>
    %cst_66 = arith.constant 0.000000e+00 : f32
    %115 = vector.broadcast %cst_66 : f32 to vector<2x4xf32>
    %116 = arith.maximumf %114, %115 : vector<2x4xf32>
    %c0_67 = arith.constant 0 : index
    %c0_68 = arith.constant 0 : index
    %117 = vector.load %arg10[%c0_67, %c0_68] : memref<4x32xf32, #tpu.memory_space<vmem>>, vector<4x32xf32>
    %cst_69 = arith.constant dense<0.000000e+00> : vector<2x32xf32>
    %118 = tpu.matmul %116, %117, %cst_69 {dimension_numbers = #tpu.dot_dimension_numbers<[1], [0], [0], [1], [0, 0, 1, 1], [], []>} : vector<2x4xf32>, vector<4x32xf32>, vector<2x32xf32> -> vector<2x32xf32>
    %c0_70 = arith.constant 0 : index
    %c0_71 = arith.constant 0 : index
    %119 = vector.load %arg12[%c0_70, %c0_71] : memref<1x32xf32, #tpu.memory_space<vmem>>, vector<1x32xf32>
    %120 = vector.broadcast %119 : vector<1x32xf32> to vector<2x32xf32>
    %121 = arith.addf %118, %120 : vector<2x32xf32>
    %cst_72 = arith.constant 0.000000e+00 : f32
    %122 = vector.broadcast %cst_72 : f32 to vector<2x32xf32>
    %123 = arith.subf %122, %121 : vector<2x32xf32>
    %124 = math.exp %123 : vector<2x32xf32>
    %cst_73 = arith.constant 1.000000e+00 : f32
    %125 = vector.broadcast %cst_73 : f32 to vector<2x32xf32>
    %126 = arith.addf %125, %124 : vector<2x32xf32>
    %cst_74 = arith.constant 1.000000e+00 : f32
    %127 = vector.broadcast %cst_74 : f32 to vector<2x32xf32>
    %128 = arith.divf %127, %126 : vector<2x32xf32>
    %c0_75 = arith.constant 0 : index
    %c0_76 = arith.constant 0 : index
    %129 = vector.load %arg11[%c0_75, %c0_76] : memref<4x32xf32, #tpu.memory_space<vmem>>, vector<4x32xf32>
    %cst_77 = arith.constant dense<0.000000e+00> : vector<2x32xf32>
    %130 = tpu.matmul %116, %129, %cst_77 {dimension_numbers = #tpu.dot_dimension_numbers<[1], [0], [0], [1], [0, 0, 1, 1], [], []>} : vector<2x4xf32>, vector<4x32xf32>, vector<2x32xf32> -> vector<2x32xf32>
    %c0_78 = arith.constant 0 : index
    %c0_79 = arith.constant 0 : index
    %131 = vector.load %arg13[%c0_78, %c0_79] : memref<1x32xf32, #tpu.memory_space<vmem>>, vector<1x32xf32>
    %132 = vector.broadcast %131 : vector<1x32xf32> to vector<2x32xf32>
    %133 = arith.addf %130, %132 : vector<2x32xf32>
    %cst_80 = arith.constant 0.000000e+00 : f32
    %134 = vector.broadcast %cst_80 : f32 to vector<2x32xf32>
    %135 = arith.subf %134, %133 : vector<2x32xf32>
    %136 = math.exp %135 : vector<2x32xf32>
    %cst_81 = arith.constant 1.000000e+00 : f32
    %137 = vector.broadcast %cst_81 : f32 to vector<2x32xf32>
    %138 = arith.addf %137, %136 : vector<2x32xf32>
    %cst_82 = arith.constant 1.000000e+00 : f32
    %139 = vector.broadcast %cst_82 : f32 to vector<2x32xf32>
    %140 = arith.divf %139, %138 : vector<2x32xf32>
    %141 = vector.shape_cast %128 : vector<2x32xf32> to vector<2x1x1x32xf32>
    %142 = vector.broadcast %141 : vector<2x1x1x32xf32> to vector<2x8x8x32xf32>
    %143 = arith.mulf %0, %142 : vector<2x8x8x32xf32>
    %144 = vector.shape_cast %140 : vector<2x32xf32> to vector<2x1x1x32xf32>
    %145 = vector.broadcast %144 : vector<2x1x1x32xf32> to vector<2x8x8x32xf32>
    %146 = arith.mulf %100, %145 : vector<2x8x8x32xf32>
    %147 = tpu.concatenate %143, %146 in 3 : vector<2x8x8x32xf32>, vector<2x8x8x32xf32> -> vector<2x8x8x64xf32>
    %c0_83 = arith.constant 0 : index
    %c0_84 = arith.constant 0 : index
    %c0_85 = arith.constant 0 : index
    %c0_86 = arith.constant 0 : index
    %148 = vector.load %arg14[%c0_83, %c0_84, %c0_85, %c0_86] : memref<2x8x8x64xf32, #tpu.memory_space<vmem>>, vector<2x8x8x64xf32>
    tpu.vector_store %arg14[%c0_83, %c0_84, %c0_85, %c0_86], %147 {strides = array<i32>} : memref<2x8x8x64xf32, #tpu.memory_space<vmem>>, vector<2x8x8x64xf32>,
    return
  }
  func.func @transform_0(%arg0: i32) -> (i32, i32, i32, i32) {
    %c0_i32 = arith.constant 0 : i32
    %c0_i32_0 = arith.constant 0 : i32
    %c0_i32_1 = arith.constant 0 : i32
    %c0_i32_2 = arith.constant 0 : i32
    return %arg0, %c0_i32, %c0_i32_0, %c0_i32_1 : i32, i32, i32, i32
  }
  func.func @transform_1(%arg0: i32) -> (i32, i32) {
    %c0_i32 = arith.constant 0 : i32
    %c0_i32_0 = arith.constant 0 : i32
    %c0_i32_1 = arith.constant 0 : i32
    return %c0_i32, %c0_i32_0 : i32, i32
  }
  func.func @transform_2(%arg0: i32) -> (i32, i32) {
    %c0_i32 = arith.constant 0 : i32
    %c0_i32_0 = arith.constant 0 : i32
    %c0_i32_1 = arith.constant 0 : i32
    return %c0_i32, %c0_i32_0 : i32, i32
  }
  func.func @transform_3(%arg0: i32) -> (i32, i32) {
    %c0_i32 = arith.constant 0 : i32
    %c0_i32_0 = arith.constant 0 : i32
    %c0_i32_1 = arith.constant 0 : i32
    return %c0_i32, %c0_i32_0 : i32, i32
  }
  func.func @transform_4(%arg0: i32) -> (i32, i32) {
    %c0_i32 = arith.constant 0 : i32
    %c0_i32_0 = arith.constant 0 : i32
    %c0_i32_1 = arith.constant 0 : i32
    return %c0_i32, %c0_i32_0 : i32, i32
  }
  func.func @transform_5(%arg0: i32) -> (i32, i32, i32) {
    %c0_i32 = arith.constant 0 : i32
    %c0_i32_0 = arith.constant 0 : i32
    %c0_i32_1 = arith.constant 0 : i32
    %c0_i32_2 = arith.constant 0 : i32
    return %c0_i32, %c0_i32_0, %c0_i32_1 : i32, i32, i32
  }
  func.func @transform_6(%arg0: i32) -> (i32, i32) {
    %c0_i32 = arith.constant 0 : i32
    %c0_i32_0 = arith.constant 0 : i32
    %c0_i32_1 = arith.constant 0 : i32
    return %c0_i32, %c0_i32_0 : i32, i32
  }
  func.func @transform_7(%arg0: i32) -> (i32, i32) {
    %c0_i32 = arith.constant 0 : i32
    %c0_i32_0 = arith.constant 0 : i32
    %c0_i32_1 = arith.constant 0 : i32
    return %c0_i32, %c0_i32_0 : i32, i32
  }
  func.func @transform_8(%arg0: i32) -> (i32, i32) {
    %c0_i32 = arith.constant 0 : i32
    %c0_i32_0 = arith.constant 0 : i32
    %c0_i32_1 = arith.constant 0 : i32
    return %c0_i32, %c0_i32_0 : i32, i32
  }
  func.func @transform_9(%arg0: i32) -> (i32, i32) {
    %c0_i32 = arith.constant 0 : i32
    %c0_i32_0 = arith.constant 0 : i32
    %c0_i32_1 = arith.constant 0 : i32
    return %c0_i32, %c0_i32_0 : i32, i32
  }
  func.func @transform_10(%arg0: i32) -> (i32, i32) {
    %c0_i32 = arith.constant 0 : i32
    %c0_i32_0 = arith.constant 0 : i32
    %c0_i32_1 = arith.constant 0 : i32
    return %c0_i32, %c0_i32_0 : i32, i32
  }
  func.func @transform_11(%arg0: i32) -> (i32, i32) {
    %c0_i32 = arith.constant 0 : i32
    %c0_i32_0 = arith.constant 0 : i32
    %c0_i32_1 = arith.constant 0 : i32
    return %c0_i32, %c0_i32_0 : i32, i32
  }
  func.func @transform_12(%arg0: i32) -> (i32, i32) {
    %c0_i32 = arith.constant 0 : i32
    %c0_i32_0 = arith.constant 0 : i32
    %c0_i32_1 = arith.constant 0 : i32
    return %c0_i32, %c0_i32_0 : i32, i32
  }
  func.func @transform_13(%arg0: i32) -> (i32, i32, i32, i32) {
    %c0_i32 = arith.constant 0 : i32
    %c0_i32_0 = arith.constant 0 : i32
    %c0_i32_1 = arith.constant 0 : i32
    %c0_i32_2 = arith.constant 0 : i32
    return %arg0, %c0_i32, %c0_i32_0, %c0_i32_1 : i32, i32, i32, i32
  }
}

</mosaic_0001>

<bundles_post_ra>
// kernel: tpu_custom_call.1
= control target key start
LH: loop header
LB: loop body
LE: loop exit
PB: predicated region body
PF: predicated region fallthrough
CT: control target
= control target key end

     0   :  { %vm155_vm0 = vcmask 261120   ;;  %s4931_s0 = inlined_call_operand.vmem [shape: f32[2,8,8,32], index: 0, kind: input, shape index: {}]   ;;  %s4932_s1 = inlined_call_operand.vmem [shape: f32[1,32], index: 1, kind: input, shape index: {}]   ;;  %s4933_s2 = inlined_call_operand.vmem [shape: f32[1,32], index: 2, kind: input, shape index: {}]   ;;  %s4934_s3 = inlined_call_operand.vmem [shape: bf16[32,128], index: 3, kind: input, shape index: {}]   ;;  %s4935_s4 = inlined_call_operand.vmem [shape: f32[1,128], index: 4, kind: input, shape index: {}]   ;;  %s4936_s5 = inlined_call_operand.vmem [shape: bf16[9,128,32], index: 5, kind: input, shape index: {}]   ;;  %s4937_s6 = inlined_call_operand.vmem [shape: f32[32,4], index: 6, kind: input, shape index: {}]   ;;  %s4938_s7 = inlined_call_operand.vmem [shape: f32[32,4], index: 7, kind: input, shape index: {}]   ;;  %s4939_s8 = inlined_call_operand.vmem [shape: f32[1,4], index: 8, kind: input, shape index: {}]   ;;  %s4940_s9 = inlined_call_operand.vmem [shape: f32[4,32], index: 9, kind: input, shape index: {}]   ;;  %s4941_s10 = inlined_call_operand.vmem [shape: f32[4,32], index: 10, kind: input, shape index: {}]   ;;  %s4942_s11 = inlined_call_operand.vmem [shape: f32[1,32], index: 11, kind: input, shape index: {}]   ;;  %s4943_s12 = inlined_call_operand.vmem [shape: f32[1,32], index: 12, kind: input, shape index: {}]   ;;  %s4944_s13 = inlined_call_operand.hbm [shape: f32[2,8,8,64], index: 13, kind: output, shape index: {}]  }
   0x1   :  { %v3631_v0 = vld [vmem:[%s4934_s3 + $0x8] sm:$0xff]   ;;  %v3632_v1 = vld [vmem:[%s4934_s3] sm:$0xff]   ;;  %v48_v4 = vld [vmem:[%s4931_s0 + $0x10] sm:$0xff] }
   0x2   :  { %3284 = vmatprep.subr.bf16.mxu0 %v3631_v0  ;;  %v46_v2 = vld [vmem:[%s4931_s0] sm:$0xff]  ;;  %v47_v3 = vld [vmem:[%s4931_s0 + $0x8] sm:$0xff]  ;;  %v49_v9 = vld [vmem:[%s4931_s0 + $0x18] sm:$0xff] }
   0x3   :  { %3285 = vmatpush3.bf16.msra.mxu0 %v3631_v0  ;;  %v3846_v5 = vld [vmem:[%s4932_s1] ss:$0 sm:$0xff]  ;;  %v51_v11 = vld [vmem:[%s4931_s0 + $0x28] sm:$0xff]  ;;  %v52_v21 = vld [vmem:[%s4931_s0 + $0x30] sm:$0xff] }
   0x4   :  { %v3851_v6 = vld [vmem:[%s4933_s2] ss:$0 sm:$0xff]  ;;  %3286 = vmatprep.subr.bf16.mxu0 %v3632_v1  ;;  %v69_v7 = vmul.f32 %v3846_v5, %v46_v2  ;;  %v70_v8 = vmul.f32 %v3846_v5, %v47_v3  ;;  %v71_v12 = vmul.f32 %v3846_v5, %v48_v4  ;;  %v72_v13 = vmul.f32 %v3846_v5, %v49_v9  ;;  %v53_v22 = vld [vmem:[%s4931_s0 + $0x38] sm:$0xff]  ;;  %v55_v31 = vld [vmem:[%s4931_s0 + $0x48] sm:$0xff] }
   0x5   :  { %v50_v10 = vld [vmem:[%s4931_s0 + $0x20] sm:$0xff]  ;;  %v74_v17 = vmul.f32 %v3846_v5, %v51_v11  ;;  %v3633_v27 = vld [vmem:[%s4936_s5 + $0x38] sm:$0xff]   ;;  %v75_v34 = vmul.f32 %v3846_v5, %v52_v21  ;;  %v56_v35 = vld [vmem:[%s4931_s0 + $0x50] sm:$0xff]  ;;  %v76_v39 = vmul.f32 %v3846_v5, %v53_v22  ;;  %v78_v46 = vmul.f32 %v3846_v5, %v55_v31 }
   0x6   :  { %v73_v14 = vmul.f32 %v3846_v5, %v50_v10  ;;  %v92_v15 = vadd.f32 %v3851_v6, %v69_v7  ;;  %v93_v16 = vadd.f32 %v3851_v6, %v70_v8  ;;  %v94_v18 = vadd.f32 %v3851_v6, %v71_v12  ;;  %v54_v26 = vld [vmem:[%s4931_s0 + $0x40] sm:$0xff]  ;;  %v57_v36 = vld [vmem:[%s4931_s0 + $0x58] sm:$0xff]  ;;  %3304 = vmatprep.subr.bf16.mxu1 %v3633_v27  ;;  %v3635_v44 = vld [vmem:[%s4936_s5 + $0x30] sm:$0xff]  }
   0x7   :  { %3287 = vmatpush3.bf16.msra.mxu0 %v3632_v1  ;;  %v95_v19 = vadd.f32 %v3851_v6, %v72_v13  ;;  %v97_v25 = vadd.f32 %v3851_v6, %v74_v17  ;;  %v3634_v37 = vld [vmem:[%s4936_s5 + $0x78] sm:$0xff]   ;;  %v58_v40 = vld [vmem:[%s4931_s0 + $0x60] sm:$0xff]  ;;  %3305 = vmatpush3.bf16.msra.mxu1 %v3633_v27  ;;  %v98_v42 = vadd.f32 %v3851_v6, %v75_v34  ;;  %v3636_v47 = vld [vmem:[%s4936_s5 + $0x70] sm:$0xff]  }
   0x8   :  { %v96_v20 = vadd.f32 %v3851_v6, %v73_v14  ;;  %v108_v23 = vmax.f32 %v92_v15, 0.0  ;;  %v109_v24 = vmax.f32 %v93_v16, 0.0  ;;  %v110_v28 = vmax.f32 %v94_v18, 0.0  ;;  %3336 = vmatprep.subr.bf16.mxu0 %v3634_v37  ;;  %v3637_v48 = vld [vmem:[%s4936_s5 + $0x28] sm:$0xff]   ;;  %3306 = vmatprep.subr.bf16.mxu1 %v3635_v44  ;;  %v60_v59 = vld [vmem:[%s4931_s0 + $0x70] sm:$0xff]  ;;  %v3639_v0 = vld [vmem:[%s4936_s5 + $0x20] sm:$0xff]  }
   0x9   :  { %v111_v29 = vmax.f32 %v95_v19, 0.0  ;;  %v113_v33 = vmax.f32 %v97_v25, 0.0  ;;  %v77_v43 = vmul.f32 %v3846_v5, %v54_v26  ;;  %v99_v45 = vadd.f32 %v3851_v6, %v76_v39  ;;  %v59_v51 = vld [vmem:[%s4931_s0 + $0x68] sm:$0xff]  ;;  %v61_v3 = vld [vmem:[%s4931_s0 + $0x78] sm:$0xff]  ;;  %v3640_v7 = vld [vmem:[%s4936_s5 + $0x60] sm:$0xff]  }
   0xa   :  { %v112_v30 = vmax.f32 %v96_v20, 0.0  ;;  %v124_v32 = vpack.c.bf16 %v109_v24, %v108_v23  ;;  %v114_v49 = vmax.f32 %v98_v42, 0.0  ;;  %v101_v53 = vadd.f32 %v3851_v6, %v78_v46  ;;  %v3638_v56 = vld [vmem:[%s4936_s5 + $0x68] sm:$0xff]   ;;  %v3641_v10 = vld [vmem:[%s4936_s5 + $0x18] sm:$0xff]  }
   0xb   :  { %v125_v38 = vpack.c.bf16 %v111_v29, %v110_v28  ;;  %v100_v50 = vadd.f32 %v3851_v6, %v77_v43  ;;  %v115_v52 = vmax.f32 %v99_v45, 0.0  ;;  %v79_v54 = vmul.f32 %v3846_v5, %v56_v35  ;;  %3307 = vmatpush3.bf16.msra.mxu1 %v3635_v44  ;;  %v3642_v14 = vld [vmem:[%s4936_s5 + $0x58] sm:$0xff]  }
   0xc   :  { %3288 = vmatprep.mubr.msk.bf16.mxu0 %vm155_vm0, %v124_v32  ;;  %v126_v41 = vpack.c.bf16 %v113_v33, %v112_v30  ;;  %v80_v55 = vmul.f32 %v3846_v5, %v57_v36  ;;  %v81_v58 = vmul.f32 %v3846_v5, %v58_v40  ;;  %v117_v61 = vmax.f32 %v101_v53, 0.0  ;;  %3308 = vmatprep.subr.bf16.mxu1 %v3637_v48 }
   0xd   :  { %3289 = vmatmul.mubr.msk.bf16.vlgmr.msra.gmra.mxu0 %vm155_vm0, %v125_v38  ;;  %v116_v57 = vmax.f32 %v100_v50, 0.0  ;;  %v127_v60 = vpack.c.bf16 %v115_v52, %v114_v49  ;;  %v102_v62 = vadd.f32 %v3851_v6, %v79_v54  ;;  %v82_v1 = vmul.f32 %v3846_v5, %v59_v51 }
   0xe   :  { %3292 = vmatprep.mubr.msk.bf16.mxu0 %vm155_vm0, %v126_v41  ;;  %3337 = vmatpush3.bf16.msra.mxu0 %v3634_v37  ;;  %v103_v63 = vadd.f32 %v3851_v6, %v80_v55  ;;  %v104_v2 = vadd.f32 %v3851_v6, %v81_v58  ;;  %v83_v9 = vmul.f32 %v3846_v5, %v60_v59 }
   0xf   :  { %3338 = vmatprep.subr.bf16.mxu0 %v3636_v47  ;;  %v128_v4 = vpack.c.bf16 %v117_v61, %v116_v57  ;;  %v105_v8 = vadd.f32 %v3851_v6, %v82_v1  ;;  %3309 = vmatpush3.bf16.msra.mxu1 %v3637_v48  ;;  %v118_v11 = vmax.f32 %v102_v62, 0.0  ;;  %v84_v13 = vmul.f32 %v3846_v5, %v61_v3 }
  0x10   :  { %v119_v12 = vmax.f32 %v103_v63, 0.0  ;;  %3310 = vmatprep.subr.bf16.mxu1 %v3639_v0  ;;  %v120_v15 = vmax.f32 %v104_v2, 0.0  ;;  %v106_v17 = vadd.f32 %v3851_v6, %v83_v9 }
  0x11   :  { %v121_v16 = vmax.f32 %v105_v8, 0.0  ;;  %v107_v18 = vadd.f32 %v3851_v6, %v84_v13 }
  0x12   :  { %3339 = vmatpush3.bf16.msra.mxu0 %v3636_v47  ;;  %v129_v19 = vpack.c.bf16 %v119_v12, %v118_v11  ;;  %v122_v20 = vmax.f32 %v106_v17, 0.0 }
  0x13   :  { %3340 = vmatprep.subr.bf16.mxu0 %v3638_v56  ;;  %3311 = vmatpush3.bf16.msra.mxu1 %v3639_v0  ;;  %v123_v21 = vmax.f32 %v107_v18, 0.0  ;;  %v130_v5 = vpack.c.bf16 %v121_v16, %v120_v15 }
  0x14   :  { %3312 = vmatprep.subr.bf16.mxu1 %v3641_v10 }
  0x15   :  { %3293 = vmatmul.mubr.msk.bf16.gmra.mxu0 %vm155_vm0, %v127_v60  ;;  %v131_v22 = vpack.c.bf16 %v123_v21, %v122_v20 }
  0x16   :  { %3296 = vmatprep.mubr.msk.bf16.mxu0 %vm155_vm0, %v128_v4  ;;  %3341 = vmatpush3.bf16.msra.mxu0 %v3638_v56 }
  0x17   :  { %3342 = vmatprep.subr.bf16.mxu0 %v3640_v7  ;;  %3313 = vmatpush3.bf16.msra.mxu1 %v3641_v10 }
  0x1a   :  { %3343 = vmatpush3.bf16.msra.mxu0 %v3640_v7 }
  0x1b   :  { %3344 = vmatprep.subr.bf16.mxu0 %v3642_v14 }
  0x1d   :  { %3297 = vmatmul.mubr.msk.bf16.gmra.mxu0 %vm155_vm0, %v129_v19 }
  0x1e   :  { %3300 = vmatprep.mubr.msk.bf16.mxu0 %vm155_vm0, %v130_v5  ;;  %3345 = vmatpush3.bf16.msra.mxu0 %v3642_v14 }
  0x25   :  { %3301 = vmatmul.mubr.msk.bf16.gmra.mxu0 %vm155_vm0, %v131_v22 }
  0x26   :  { %18 = vsyncpa [#allocation3], 0  ;;  %v3643_v6 = vld [vmem:[%s4936_s5 + $0x10] sm:$0xff]   ;;  %v3645_v24 = vld [vmem:[%s4936_s5 + $0x8] sm:$0xff]   ;;  %vm505_vm1 = vcmask 1040384   ;;  %vm915_vm2 = vcmask 1046528  }
  0x27   :  { %v3644_v23 = vld [vmem:[%s4936_s5 + $0x50] sm:$0xff]   ;;  %3314 = vmatprep.subr.bf16.mxu1 %v3643_v6  ;;  %v3646_v25 = vld [vmem:[%s4936_s5 + $0x48] sm:$0xff]   ;;  %v3647_v26 = vld [vmem:[%s4936_s5] sm:$0xff]   ;;  %vm3752_vm3 = vmmov 0   ;;  %vm2346_vm4 = vcmask 1041409   ;;  %vm2516_vm5 = vcmask 1043456  }
  0x28   :  { %3346 = vmatprep.subr.bf16.mxu0 %v3644_v23  ;;  %3315 = vmatpush3.bf16.msra.mxu1 %v3643_v6  ;;  %v3648_v27 = vld [vmem:[%s4936_s5 + $0x40] sm:$0xff]   ;;  %v3649_v28 = vld [vmem:[%s4936_s5 + $0xb8] sm:$0xff]   ;;  %v3651_v48 = vld [vmem:[%s4936_s5 + $0xb0] sm:$0xff]   ;;  %vm2512_vm6 = vcmask 31744   ;;  %vm2861_vm7 = vcmask 523264  }
  0x29   :  { %3347 = vmatpush3.bf16.msra.mxu0 %v3644_v23  ;;  %3316 = vmatprep.subr.bf16.mxu1 %v3645_v24  ;;  %v3650_v29 = vld [vmem:[%s4936_s5 + $0xf8] sm:$0xff]   ;;  %v3989_v32 = vld [vmem:[%s4935_s4] ss:$0 sm:$0xff]  ;;  %v3652_v49 = vld [vmem:[%s4936_s5 + $0xf0] sm:$0xff]  }
  0x2a   :  { %3348 = vmatprep.subr.bf16.mxu0 %v3646_v25  ;;  %v3653_v57 = vld [vmem:[%s4936_s5 + $0xa8] sm:$0xff]   ;;  %v3655_v2 = vld [vmem:[%s4936_s5 + $0xa0] sm:$0xff]   ;;  %v3657_v13 = vld [vmem:[%s4936_s5 + $0x98] sm:$0xff]  }
  0x2b   :  { %v3654_v58 = vld [vmem:[%s4936_s5 + $0xe8] sm:$0xff]   ;;  %v3656_v3 = vld [vmem:[%s4936_s5 + $0xe0] sm:$0xff]   ;;  %v3658_v14 = vld [vmem:[%s4936_s5 + $0xd8] sm:$0xff]  }
  0x2c   :  { %3317 = vmatpush3.bf16.msra.mxu1 %v3645_v24  ;;  %v3659_v5 = vld [vmem:[%s4936_s5 + $0x90] sm:$0xff]  }
  0x2d   :  { %3349 = vmatpush3.bf16.msra.mxu0 %v3646_v25  ;;  %3318 = vmatprep.subr.bf16.mxu1 %v3647_v26  ;;  %v3660_v22 = vld [vmem:[%s4936_s5 + $0xd0] sm:$0xff]  }
  0x2e   :  { %3350 = vmatprep.subr.bf16.mxu0 %v3648_v27 }
  0x30   :  { %3319 = vmatpush3.bf16.msra.mxu1 %v3647_v26 }
  0x31   :  { %3351 = vmatpush3.bf16.msra.mxu0 %v3648_v27  ;;  %3368 = vmatprep.subr.bf16.mxu1 %v3649_v28 }
  0x32   :  { %3400 = vmatprep.subr.bf16.mxu0 %v3650_v29 }
  0xcd   :  { %v3290_v30 = vpop.f32.mrf.mxu0 }
  0xce   :  { %v223_v36 = vadd.f32 %v3290_v30, %v3989_v32 }
  0xcf   :  { %v214_v31 = vpop.f32.mrf.mxu0 }
  0xd0   :  { %v215_v34 = vadd.f32 %v3989_v32, %v214_v31  ;;  %v279_v43 = vmax.f32 %v223_v36, 0.0  ;;  %v3664_v36 = vld [vmem:[%s4936_s5 + $0xc0] sm:$0xff]  }
  0xd1   :  { %v3291_v33 = vpop.f32.mrf.mxu0 }
  0xd2   :  { %v226_v35 = vadd.f32 %v3291_v33, %v3989_v32  ;;  %v277_v41 = vmax.f32 %v215_v34, 0.0 }
  0xd3   :  { %v217_v37 = vpop.f32.mrf.mxu0 }
  0xd4   :  { %v218_v38 = vadd.f32 %v3989_v32, %v217_v37  ;;  %v280_v39 = vmax.f32 %v226_v35, 0.0  ;;  %v3663_v35 = vld [vmem:[%s4936_s5 + $0x80] sm:$0xff]   ;;  %v3665_v37 = vld [vmem:[%s4936_s5 + $0x138] sm:$0xff]  }
  0xd5   :  { %v3294_v40 = vpop.f32.mrf.mxu0 }
  0xd6   :  { %v278_v42 = vmax.f32 %v218_v38, 0.0  ;;  %v3997_v46 = vpack.c.bf16 %v280_v39, %v279_v43  ;;  %v239_v52 = vadd.f32 %v3294_v40, %v3989_v32  ;;  %v3666_v38 = vld [vmem:[%s4936_s5 + $0x178] sm:$0xff]   ;;  %v3667_v39 = vld [vmem:[%s4936_s5 + $0x130] sm:$0xff]   ;;  %v3671_v43 = vld [vmem:[%s4936_s5 + $0x120] sm:$0xff]  }
  0xd7   :  { %v230_v44 = vpop.f32.mrf.mxu0  ;;  %v3668_v40 = vld [vmem:[%s4936_s5 + $0x170] sm:$0xff]  }
  0xd8   :  { %v3995_v45 = vpack.c.bf16 %v278_v42, %v277_v41  ;;  %v231_v50 = vadd.f32 %v3989_v32, %v230_v44  ;;  %v283_v61 = vmax.f32 %v239_v52, 0.0  ;;  %v3669_v41 = vld [vmem:[%s4936_s5 + $0x128] sm:$0xff]   ;;  %v3672_v44 = vld [vmem:[%s4936_s5 + $0x160] sm:$0xff]  }
  0xd9   :  { %v3295_v47 = vpop.f32.mrf.mxu0  ;;  %v3670_v42 = vld [vmem:[%s4936_s5 + $0x168] sm:$0xff]  }
  0xda   :  { %v242_v51 = vadd.f32 %v3295_v47, %v3989_v32  ;;  %3320 = vmatprep.mubr.bf16.mxu1 %v3995_v45  ;;  %3352 = vmatprep.mubr.bf16.mxu0 %v3995_v45  ;;  %v281_v59 = vmax.f32 %v231_v50, 0.0  ;;  %v3673_v47 = vld [vmem:[%s4936_s5 + $0x118] sm:$0xff]   ;;  %v3676_v50 = vld [vmem:[%s4936_s5 + $0x150] sm:$0xff]   ;;  %v3678_v52 = vld [vmem:[%s4936_s5 + $0x148] sm:$0xff]  }
  0xdb   :  { %v233_v53 = vpop.f32.mrf.mxu0  ;;  %3321 = vmatmul.mubr.bf16.vlgmr.msra.gmra.mxu1 %v3997_v46  ;;  %3353 = vmatmul.mubr.bf16.vlgmr.msra.gmra.mxu0 %v3997_v46 }
  0xdc   :  { %v234_v54 = vadd.f32 %v3989_v32, %v233_v53  ;;  %3369 = vmatpush3.bf16.msra.mxu1 %v3649_v28  ;;  %3401 = vmatpush3.bf16.msra.mxu0 %v3650_v29  ;;  %v284_v55 = vmax.f32 %v242_v51, 0.0  ;;  %v3661_v28 = vld [vmem:[%s4936_s5 + $0x88] sm:$0xff]   ;;  %v3679_v53 = vld [vmem:[%s4936_s5 + $0x100] sm:$0xff]  }
  0xdd   :  { %v3298_v56 = vpop.f32.mrf.mxu0  ;;  %3370 = vmatprep.subr.bf16.mxu1 %v3651_v48  ;;  %3402 = vmatprep.subr.bf16.mxu0 %v3652_v49  ;;  %v3662_v29 = vld [vmem:[%s4936_s5 + $0xc8] sm:$0xff]  }
  0xde   :  { %v282_v60 = vmax.f32 %v234_v54, 0.0  ;;  %v4021_v0 = vpack.c.bf16 %v284_v55, %v283_v61  ;;  %v255_v8 = vadd.f32 %v3298_v56, %v3989_v32  ;;  %v3677_v51 = vld [vmem:[%s4936_s5 + $0x108] sm:$0xff]   ;;  %v3680_v54 = vld [vmem:[%s4936_s5 + $0x140] sm:$0xff]   ;;  %v3681_v55 = vld [vmem:[%s4936_s5 + $0x1b8] sm:$0xff]  }
  0xdf   :  { %v246_v62 = vpop.f32.mrf.mxu0  ;;  %v3682_v56 = vld [vmem:[%s4936_s5 + $0x1f8] sm:$0xff]   ;;  %v3687_v61 = vld [vmem:[%s4936_s5 + $0x1a0] sm:$0xff]  }
  0xe0   :  { %v4019_v63 = vpack.c.bf16 %v282_v60, %v281_v59  ;;  %3371 = vmatpush3.bf16.msra.mxu1 %v3651_v48  ;;  %3403 = vmatpush3.bf16.msra.mxu0 %v3652_v49  ;;  %v247_v4 = vadd.f32 %v3989_v32, %v246_v62  ;;  %v287_v17 = vmax.f32 %v255_v8, 0.0  ;;  %v3674_v48 = vld [vmem:[%s4936_s5 + $0x158] sm:$0xff]   ;;  %v3675_v49 = vld [vmem:[%s4936_s5 + $0x110] sm:$0xff]   ;;  %v3685_v59 = vld [vmem:[%s4936_s5 + $0x1a8] sm:$0xff]  }
  0xe1   :  { %v3299_v1 = vpop.f32.mrf.mxu0  ;;  %3372 = vmatprep.subr.bf16.mxu1 %v3653_v57  ;;  %3404 = vmatprep.subr.bf16.mxu0 %v3654_v58  ;;  %v3686_v60 = vld [vmem:[%s4936_s5 + $0x1e8] sm:$0xff]   ;;  %v3688_v62 = vld [vmem:[%s4936_s5 + $0x1e0] sm:$0xff]  }
  0xe2   :  { %v258_v7 = vadd.f32 %v3299_v1, %v3989_v32  ;;  %3324 = vmatprep.mubr.bf16.mxu1 %v4019_v63  ;;  %3356 = vmatprep.mubr.bf16.mxu0 %v4019_v63  ;;  %v285_v15 = vmax.f32 %v247_v4, 0.0  ;;  %v3689_v1 = vld [vmem:[%s4936_s5 + $0x198] sm:$0xff]   ;;  %v3692_v4 = vld [vmem:[%s4936_s5 + $0x1d0] sm:$0xff]   ;;  %v3694_v8 = vld [vmem:[%s4936_s5 + $0x1c8] sm:$0xff]  }
  0xe3   :  { %v249_v9 = vpop.f32.mrf.mxu0  ;;  %3325 = vmatmul.mubr.bf16.gmra.mxu1 %v4021_v0  ;;  %3357 = vmatmul.mubr.bf16.gmra.mxu0 %v4021_v0 }
  0xe4   :  { %v250_v10 = vadd.f32 %v3989_v32, %v249_v9  ;;  %3373 = vmatpush3.bf16.msra.mxu1 %v3653_v57  ;;  %3405 = vmatpush3.bf16.msra.mxu0 %v3654_v58  ;;  %v288_v11 = vmax.f32 %v258_v7, 0.0  ;;  %v3683_v57 = vld [vmem:[%s4936_s5 + $0x1b0] sm:$0xff]   ;;  %v3693_v7 = vld [vmem:[%s4936_s5 + $0x188] sm:$0xff]   ;;  %v3695_v9 = vld [vmem:[%s4936_s5 + $0x180] sm:$0xff]  }
  0xe5   :  { %v3302_v12 = vpop.f32.mrf.mxu0  ;;  %3374 = vmatprep.subr.bf16.mxu1 %v3655_v2  ;;  %3406 = vmatprep.subr.bf16.mxu0 %v3656_v3  ;;  %v3684_v58 = vld [vmem:[%s4936_s5 + $0x1f0] sm:$0xff]  }
  0xe6   :  { %v286_v16 = vmax.f32 %v250_v10, 0.0  ;;  %v4045_v20 = vpack.c.bf16 %v288_v11, %v287_v17  ;;  %v271_v24 = vadd.f32 %v3302_v12, %v3989_v32  ;;  %v3696_v10 = vld [vmem:[%s4936_s5 + $0x1c0] sm:$0xff]   ;;  %v3697_v11 = vld [vmem:[%s4936_s5 + $0x238] sm:$0xff]   ;;  %v3698_v12 = vld [vmem:[%s4936_s5 + $0x230] sm:$0xff]  }
  0xe7   :  { %v262_v18 = vpop.f32.mrf.mxu0  ;;  %v3702_v17 = vld [vmem:[%s4936_s5 + $0x210] sm:$0xff]  }
  0xe8   :  { %v4043_v19 = vpack.c.bf16 %v286_v16, %v285_v15  ;;  %3375 = vmatpush3.bf16.msra.mxu1 %v3655_v2  ;;  %3407 = vmatpush3.bf16.msra.mxu0 %v3656_v3  ;;  %v263_v6 = vadd.f32 %v3989_v32, %v262_v18  ;;  %v291_v33 = vmax.f32 %v271_v24, 0.0  ;;  %v3690_v2 = vld [vmem:[%s4936_s5 + $0x1d8] sm:$0xff]   ;;  %v3691_v3 = vld [vmem:[%s4936_s5 + $0x190] sm:$0xff]   ;;  %v3700_v15 = vld [vmem:[%s4936_s5 + $0x220] sm:$0xff]  }
  0xe9   :  { %v3303_v21 = vpop.f32.mrf.mxu0  ;;  %3376 = vmatprep.subr.bf16.mxu1 %v3657_v13  ;;  %3408 = vmatprep.subr.bf16.mxu0 %v3658_v14  ;;  %v3701_v16 = vld [vmem:[%s4936_s5 + $0x218] sm:$0xff]   ;;  %v3703_v18 = vld [vmem:[%s4936_s5 + $0x208] sm:$0xff]  }
  0xea   :  { %v274_v23 = vadd.f32 %v3303_v21, %v3989_v32  ;;  %3328 = vmatprep.mubr.bf16.mxu1 %v4043_v19  ;;  %3360 = vmatprep.mubr.bf16.mxu0 %v4043_v19  ;;  %v289_v30 = vmax.f32 %v263_v6, 0.0  ;;  %v3704_v21 = vld [vmem:[%s4936_s5 + $0x200] sm:$0xff]  }
  0xeb   :  { %v265_v25 = vpop.f32.mrf.mxu0  ;;  %3329 = vmatmul.mubr.bf16.gmra.mxu1 %v4045_v20  ;;  %3361 = vmatmul.mubr.bf16.gmra.mxu0 %v4045_v20 }
  0xec   :  { %v266_v26 = vadd.f32 %v3989_v32, %v265_v25  ;;  %3377 = vmatpush3.bf16.msra.mxu1 %v3657_v13  ;;  %3409 = vmatpush3.bf16.msra.mxu0 %v3658_v14  ;;  %v292_v27 = vmax.f32 %v274_v23, 0.0  ;;  %v3699_v13 = vld [vmem:[%s4936_s5 + $0x228] sm:$0xff]   ;;  %v4945_v14 = vmov 0.0  }
  0xed   :  { %3378 = vmatprep.subr.bf16.mxu1 %v3659_v5  ;;  %3410 = vmatprep.subr.bf16.mxu0 %v3660_v22 }
  0xee   :  { %v290_v31 = vmax.f32 %v266_v26, 0.0  ;;  %v4069_v32 = vpack.c.bf16 %v292_v27, %v291_v33 }
  0xf0   :  { %v4067_v34 = vpack.c.bf16 %v290_v31, %v289_v30  ;;  %3379 = vmatpush3.bf16.msra.mxu1 %v3659_v5  ;;  %3411 = vmatpush3.bf16.msra.mxu0 %v3660_v22 }
  0xf1   :  { %3380 = vmatprep.subr.bf16.mxu1 %v3661_v28  ;;  %3412 = vmatprep.subr.bf16.mxu0 %v3662_v29 }
  0xf2   :  { %3332 = vmatprep.mubr.bf16.mxu1 %v4067_v34  ;;  %3364 = vmatprep.mubr.bf16.mxu0 %v4067_v34 }
  0xf3   :  { %3333 = vmatmul.mubr.bf16.gmra.mxu1 %v4069_v32  ;;  %3365 = vmatmul.mubr.bf16.gmra.mxu0 %v4069_v32 }
  0xf4   :  { %3381 = vmatpush3.bf16.msra.mxu1 %v3661_v28  ;;  %3384 = vmatprep.mubr.bf16.mxu1 %v3995_v45 }
  0xf5   :  { %3413 = vmatpush3.bf16.msra.mxu0 %v3662_v29  ;;  %3416 = vmatprep.mubr.bf16.mxu0 %v3995_v45 }
  0xf6   :  { %3382 = vmatprep.subr.bf16.mxu1 %v3663_v35  ;;  %3414 = vmatprep.subr.bf16.mxu0 %v3664_v36 }
  0xf8   :  { %3383 = vmatpush3.bf16.msra.mxu1 %v3663_v35 }
  0xf9   :  { %3415 = vmatpush3.bf16.msra.mxu0 %v3664_v36  ;;  %3432 = vmatprep.subr.bf16.mxu1 %v3665_v37 }
  0xfa   :  { %3464 = vmatprep.subr.bf16.mxu0 %v3666_v38 }
  0xfb   :  { %3385 = vmatmul.mubr.bf16.vlgmr.msra.gmra.mxu1 %v3997_v46 }
  0xfc   :  { %3417 = vmatmul.mubr.bf16.vlgmr.msra.gmra.mxu0 %v3997_v46  ;;  %3433 = vmatpush3.bf16.msra.mxu1 %v3665_v37 }
  0xfd   :  { %3388 = vmatprep.mubr.bf16.mxu1 %v4019_v63  ;;  %3420 = vmatprep.mubr.bf16.mxu0 %v4019_v63 }
  0xfe   :  { %3465 = vmatpush3.bf16.msra.mxu0 %v3666_v38  ;;  %3434 = vmatprep.subr.bf16.mxu1 %v3667_v39 }
  0xff   :  { %3466 = vmatprep.subr.bf16.mxu0 %v3668_v40 }
 0x100   :  { %3435 = vmatpush3.bf16.msra.mxu1 %v3667_v39 }
 0x101   :  { %3436 = vmatprep.subr.bf16.mxu1 %v3669_v41 }
 0x102   :  { %3467 = vmatpush3.bf16.msra.mxu0 %v3668_v40 }
 0x103   :  { %3389 = vmatmul.mubr.bf16.gmra.mxu1 %v4021_v0  ;;  %3468 = vmatprep.subr.bf16.mxu0 %v3670_v42 }
 0x104   :  { %3421 = vmatmul.mubr.bf16.gmra.mxu0 %v4021_v0  ;;  %3437 = vmatpush3.bf16.msra.mxu1 %v3669_v41 }
 0x105   :  { %3392 = vmatprep.mubr.bf16.mxu1 %v4043_v19  ;;  %3424 = vmatprep.mubr.bf16.mxu0 %v4043_v19 }
 0x106   :  { %3469 = vmatpush3.bf16.msra.mxu0 %v3670_v42  ;;  %3438 = vmatprep.subr.bf16.mxu1 %v3671_v43 }
 0x107   :  { %3470 = vmatprep.subr.bf16.mxu0 %v3672_v44 }
 0x108   :  { %3439 = vmatpush3.bf16.msra.mxu1 %v3671_v43 }
 0x109   :  { %3440 = vmatprep.subr.bf16.mxu1 %v3673_v47 }
 0x10a   :  { %3471 = vmatpush3.bf16.msra.mxu0 %v3672_v44 }
 0x10b   :  { %3393 = vmatmul.mubr.bf16.gmra.mxu1 %v4045_v20  ;;  %3472 = vmatprep.subr.bf16.mxu0 %v3674_v48 }
 0x10c   :  { %3425 = vmatmul.mubr.bf16.gmra.mxu0 %v4045_v20  ;;  %3441 = vmatpush3.bf16.msra.mxu1 %v3673_v47 }
 0x10d   :  { %3396 = vmatprep.mubr.bf16.mxu1 %v4067_v34  ;;  %3428 = vmatprep.mubr.bf16.mxu0 %v4067_v34 }
 0x10e   :  { %3473 = vmatpush3.bf16.msra.mxu0 %v3674_v48  ;;  %3442 = vmatprep.subr.bf16.mxu1 %v3675_v49 }
 0x10f   :  { %3474 = vmatprep.subr.bf16.mxu0 %v3676_v50 }
 0x110   :  { %3443 = vmatpush3.bf16.msra.mxu1 %v3675_v49 }
 0x111   :  { %3444 = vmatprep.subr.bf16.mxu1 %v3677_v51 }
 0x112   :  { %3475 = vmatpush3.bf16.msra.mxu0 %v3676_v50 }
 0x113   :  { %3397 = vmatmul.mubr.bf16.gmra.mxu1 %v4069_v32  ;;  %3476 = vmatprep.subr.bf16.mxu0 %v3678_v52 }
 0x114   :  { %3429 = vmatmul.mubr.bf16.gmra.mxu0 %v4069_v32  ;;  %3445 = vmatpush3.bf16.msra.mxu1 %v3677_v51 }
 0x115   :  { %3448 = vmatprep.mubr.bf16.mxu1 %v3995_v45  ;;  %3480 = vmatprep.mubr.bf16.mxu0 %v3995_v45 }
 0x116   :  { %3477 = vmatpush3.bf16.msra.mxu0 %v3678_v52  ;;  %3446 = vmatprep.subr.bf16.mxu1 %v3679_v53 }
 0x117   :  { %3478 = vmatprep.subr.bf16.mxu0 %v3680_v54 }
 0x118   :  { %3447 = vmatpush3.bf16.msra.mxu1 %v3679_v53 }
 0x119   :  { %3496 = vmatprep.subr.bf16.mxu1 %v3681_v55 }
 0x11a   :  { %3479 = vmatpush3.bf16.msra.mxu0 %v3680_v54 }
 0x11b   :  { %3449 = vmatmul.mubr.bf16.vlgmr.msra.gmra.mxu1 %v3997_v46  ;;  %3528 = vmatprep.subr.bf16.mxu0 %v3682_v56 }
 0x11c   :  { %3497 = vmatpush3.bf16.msra.mxu1 %v3681_v55  ;;  %3452 = vmatprep.mubr.bf16.mxu1 %v4019_v63 }
 0x11d   :  { %3481 = vmatmul.mubr.bf16.vlgmr.msra.gmra.mxu0 %v3997_v46  ;;  %3498 = vmatprep.subr.bf16.mxu1 %v3683_v57 }
 0x11e   :  { %3484 = vmatprep.mubr.bf16.mxu0 %v4019_v63  ;;  %3529 = vmatpush3.bf16.msra.mxu0 %v3682_v56 }
 0x11f   :  { %3530 = vmatprep.subr.bf16.mxu0 %v3684_v58 }
 0x120   :  { %3499 = vmatpush3.bf16.msra.mxu1 %v3683_v57 }
 0x121   :  { %3500 = vmatprep.subr.bf16.mxu1 %v3685_v59 }
 0x122   :  { %3531 = vmatpush3.bf16.msra.mxu0 %v3684_v58 }
 0x123   :  { %3453 = vmatmul.mubr.bf16.gmra.mxu1 %v4021_v0  ;;  %3532 = vmatprep.subr.bf16.mxu0 %v3686_v60 }
 0x124   :  { %3501 = vmatpush3.bf16.msra.mxu1 %v3685_v59  ;;  %3456 = vmatprep.mubr.bf16.mxu1 %v4043_v19 }
 0x125   :  { %3485 = vmatmul.mubr.bf16.gmra.mxu0 %v4021_v0  ;;  %3502 = vmatprep.subr.bf16.mxu1 %v3687_v61 }
 0x126   :  { %3488 = vmatprep.mubr.bf16.mxu0 %v4043_v19  ;;  %3533 = vmatpush3.bf16.msra.mxu0 %v3686_v60 }
 0x127   :  { %3534 = vmatprep.subr.bf16.mxu0 %v3688_v62 }
 0x128   :  { %3503 = vmatpush3.bf16.msra.mxu1 %v3687_v61 }
 0x129   :  { %3504 = vmatprep.subr.bf16.mxu1 %v3689_v1 }
 0x12a   :  { %3535 = vmatpush3.bf16.msra.mxu0 %v3688_v62 }
 0x12b   :  { %3457 = vmatmul.mubr.bf16.gmra.mxu1 %v4045_v20  ;;  %3536 = vmatprep.subr.bf16.mxu0 %v3690_v2 }
 0x12c   :  { %3505 = vmatpush3.bf16.msra.mxu1 %v3689_v1  ;;  %3460 = vmatprep.mubr.bf16.mxu1 %v4067_v34 }
 0x12d   :  { %3489 = vmatmul.mubr.bf16.gmra.mxu0 %v4045_v20  ;;  %3506 = vmatprep.subr.bf16.mxu1 %v3691_v3 }
 0x12e   :  { %3492 = vmatprep.mubr.bf16.mxu0 %v4067_v34  ;;  %3537 = vmatpush3.bf16.msra.mxu0 %v3690_v2 }
 0x12f   :  { %3538 = vmatprep.subr.bf16.mxu0 %v3692_v4 }
 0x130   :  { %3507 = vmatpush3.bf16.msra.mxu1 %v3691_v3 }
 0x131   :  { %3508 = vmatprep.subr.bf16.mxu1 %v3693_v7 }
 0x132   :  { %3539 = vmatpush3.bf16.msra.mxu0 %v3692_v4 }
 0x133   :  { %3461 = vmatmul.mubr.bf16.gmra.mxu1 %v4069_v32  ;;  %3540 = vmatprep.subr.bf16.mxu0 %v3694_v8 }
 0x134   :  { %3509 = vmatpush3.bf16.msra.mxu1 %v3693_v7  ;;  %3512 = vmatprep.mubr.bf16.mxu1 %v3995_v45 }
 0x135   :  { %3493 = vmatmul.mubr.bf16.gmra.mxu0 %v4069_v32  ;;  %3510 = vmatprep.subr.bf16.mxu1 %v3695_v9 }
 0x136   :  { %3541 = vmatpush3.bf16.msra.mxu0 %v3694_v8  ;;  %3544 = vmatprep.mubr.bf16.mxu0 %v3995_v45 }
 0x137   :  { %3542 = vmatprep.subr.bf16.mxu0 %v3696_v10 }
 0x138   :  { %3511 = vmatpush3.bf16.msra.mxu1 %v3695_v9 }
 0x139   :  { %3560 = vmatprep.subr.bf16.mxu1 %v3697_v11 }
 0x13a   :  { %3543 = vmatpush3.bf16.msra.mxu0 %v3696_v10 }
 0x13b   :  { %3513 = vmatmul.mubr.bf16.vlgmr.msra.gmra.mxu1 %v3997_v46  ;;  %3592 = vmatprep.subr.mxu0 %v4945_v14 }
 0x13c   :  { %3561 = vmatpush3.bf16.msra.mxu1 %v3697_v11  ;;  %3516 = vmatprep.mubr.bf16.mxu1 %v4019_v63 }
 0x13d   :  { %3545 = vmatmul.mubr.bf16.vlgmr.msra.gmra.mxu0 %v3997_v46  ;;  %3562 = vmatprep.subr.bf16.mxu1 %v3698_v12 }
 0x13e   :  { %3548 = vmatprep.mubr.bf16.mxu0 %v4019_v63 }
 0x140   :  { %3563 = vmatpush3.bf16.msra.mxu1 %v3698_v12 }
 0x141   :  { %3564 = vmatprep.subr.bf16.mxu1 %v3699_v13 }
 0x143   :  { %3517 = vmatmul.mubr.bf16.gmra.mxu1 %v4021_v0 }
 0x144   :  { %3565 = vmatpush3.bf16.msra.mxu1 %v3699_v13  ;;  %3520 = vmatprep.mubr.bf16.mxu1 %v4043_v19 }
 0x145   :  { %3549 = vmatmul.mubr.bf16.gmra.mxu0 %v4021_v0  ;;  %3566 = vmatprep.subr.bf16.mxu1 %v3700_v15 }
 0x146   :  { %3552 = vmatprep.mubr.bf16.mxu0 %v4043_v19 }
 0x148   :  { %3567 = vmatpush3.bf16.msra.mxu1 %v3700_v15 }
 0x149   :  { %3568 = vmatprep.subr.bf16.mxu1 %v3701_v16 }
 0x14b   :  { %3521 = vmatmul.mubr.bf16.gmra.mxu1 %v4045_v20 }
 0x14c   :  { %3569 = vmatpush3.bf16.msra.mxu1 %v3701_v16  ;;  %3524 = vmatprep.mubr.bf16.mxu1 %v4067_v34 }
 0x14d   :  { %3553 = vmatmul.mubr.bf16.gmra.mxu0 %v4045_v20  ;;  %3570 = vmatprep.subr.bf16.mxu1 %v3702_v17 }
 0x14e   :  { %3556 = vmatprep.mubr.bf16.mxu0 %v4067_v34 }
 0x150   :  { %3571 = vmatpush3.bf16.msra.mxu1 %v3702_v17 }
 0x151   :  { %3572 = vmatprep.subr.bf16.mxu1 %v3703_v18 }
 0x153   :  { %3525 = vmatmul.mubr.bf16.gmra.mxu1 %v4069_v32 }
 0x154   :  { %3573 = vmatpush3.bf16.msra.mxu1 %v3703_v18  ;;  %3576 = vmatprep.mubr.bf16.mxu1 %v3995_v45 }
 0x155   :  { %3557 = vmatmul.mubr.bf16.gmra.mxu0 %v4069_v32  ;;  %3574 = vmatprep.subr.bf16.mxu1 %v3704_v21 }
 0x156   :  { %3600 = vmatprep.mubr.msk.f32.mxu0 %vm3752_vm3, %v4945_v14 }
 0x158   :  { %3575 = vmatpush3.bf16.msra.mxu1 %v3704_v21 }
 0x15b   :  { %3577 = vmatmul.mubr.bf16.vlgmr.msra.gmra.mxu1 %v3997_v46 }
 0x15c   :  { %3580 = vmatprep.mubr.bf16.mxu1 %v4019_v63 }
 0x163   :  { %3581 = vmatmul.mubr.bf16.gmra.mxu1 %v4021_v0 }
 0x164   :  { %3584 = vmatprep.mubr.bf16.mxu1 %v4043_v19 }
 0x16b   :  { %3585 = vmatmul.mubr.bf16.gmra.mxu1 %v4045_v20 }
 0x16c   :  { %3588 = vmatprep.mubr.bf16.mxu1 %v4067_v34 }
 0x173   :  { %3589 = vmatmul.mubr.bf16.gmra.mxu1 %v4069_v32 }
 0x19b   :  { %v3322_v5 = vpop.f32.mrf.mxu1  ;;  %v3354_v45 = vpop.f32.mrf.mxu0 }
 0x19c   :  { %v478_v22 = vrot.slane %v3322_v5, 7 }
 0x19d   :  { %v399_v6 = vpop.f32.mrf.mxu1  ;;  %v635_v23 = vpop.f32.mrf.mxu0 }
 0x19e   :  { %v509_v46 = vsel %vm505_vm1, 0.0, %v478_v22  ;;  %v476_v24 = vrot.slane %v399_v6, 7 }
 0x19f   :  { %v4259_v63 = vadd.f32 %v3354_v45, %v509_v46  ;;  %v3323_v0 = vpop.f32.mrf.mxu1  ;;  %v3355_v25 = vpop.f32.mrf.mxu0 }
 0x1a0   :  { %v507_v19 = vsel %vm505_vm1, 0.0, %v476_v24  ;;  %v479_v20 = vrot.slane %v3323_v0, 7 }
 0x1a1   :  { %v4262_v26 = vadd.f32 %v635_v23, %v507_v19  ;;  %v402_v27 = vpop.f32.mrf.mxu1  ;;  %v638_v28 = vpop.f32.mrf.mxu0 }
 0x1a2   :  { %v510_v29 = vsel %vm505_vm1, 0.0, %v479_v20  ;;  %v477_v30 = vrot.slane %v402_v27, 7 }
 0x1a3   :  { %v4265_v31 = vadd.f32 %v3355_v25, %v510_v29  ;;  %v3326_v33 = vpop.f32.mrf.mxu1  ;;  %v3358_v34 = vpop.f32.mrf.mxu0 }
 0x1a4   :  { %v508_v32 = vsel %vm505_vm1, 0.0, %v477_v30  ;;  %v482_v35 = vrot.slane %v3326_v33, 7  ;;  %v2343_v33 = vld [vmem:[%s4938_s7 + $0x18] sm:$0xff] }
 0x1a5   :  { %v4268_v36 = vadd.f32 %v638_v28, %v508_v32  ;;  %v415_v37 = vpop.f32.mrf.mxu1  ;;  %v651_v38 = vpop.f32.mrf.mxu0  ;;  %3593 = vmatpush3.msra.mxu0 %v2343_v33 }
 0x1a6   :  { %v513_v39 = vsel %vm505_vm1, 0.0, %v482_v35  ;;  %v480_v40 = vrot.slane %v415_v37, 7  ;;  %3594 = vmatprep.subr.mxu0 %v4945_v14 }
 0x1a7   :  { %v4271_v41 = vadd.f32 %v3358_v34, %v513_v39  ;;  %v3327_v42 = vpop.f32.mrf.mxu1  ;;  %v3359_v43 = vpop.f32.mrf.mxu0 }
 0x1a8   :  { %v511_v44 = vsel %vm505_vm1, 0.0, %v480_v40 }
 0x1a9   :  { %v4274_v47 = vadd.f32 %v651_v38, %v511_v44  ;;  %v418_v48 = vpop.f32.mrf.mxu1  ;;  %v654_v49 = vpop.f32.mrf.mxu0 }
 0x1aa   :  { %v481_v50 = vrot.slane %v418_v48, 7 }
 0x1ab   :  { %v3330_v51 = vpop.f32.mrf.mxu1  ;;  %v3362_v52 = vpop.f32.mrf.mxu0 }
 0x1ac   :  { %v512_v53 = vsel %vm505_vm1, 0.0, %v481_v50  ;;  %v485_v54 = vrot.slane %v3330_v51, 7 }
 0x1ad   :  { %v4277_v55 = vadd.f32 %v654_v49, %v512_v53  ;;  %v430_v56 = vpop.f32.mrf.mxu1  ;;  %v666_v57 = vpop.f32.mrf.mxu0 }
 0x1ae   :  { %v516_v58 = vsel %vm505_vm1, 0.0, %v485_v54  ;;  %v483_v59 = vrot.slane %v430_v56, 7 }
 0x1af   :  { %v4280_v60 = vadd.f32 %v3362_v52, %v516_v58  ;;  %v3331_v61 = vpop.f32.mrf.mxu1  ;;  %v3363_v62 = vpop.f32.mrf.mxu0 }
 0x1b0   :  { %v514_v1 = vsel %vm505_vm1, 0.0, %v483_v59  ;;  %v486_v2 = vrot.slane %v3331_v61, 7 }
 0x1b1   :  { %v4283_v3 = vadd.f32 %v666_v57, %v514_v1  ;;  %v433_v4 = vpop.f32.mrf.mxu1  ;;  %v669_v7 = vpop.f32.mrf.mxu0 }
 0x1b2   :  { %v517_v8 = vsel %vm505_vm1, 0.0, %v486_v2  ;;  %v484_v9 = vrot.slane %v433_v4, 7 }
 0x1b3   :  { %v4286_v10 = vadd.f32 %v3363_v62, %v517_v8  ;;  %v3334_v11 = vpop.f32.mrf.mxu1  ;;  %v3366_v12 = vpop.f32.mrf.mxu0 }
 0x1b4   :  { %v515_v13 = vsel %vm505_vm1, 0.0, %v484_v9  ;;  %v489_v15 = vrot.slane %v3334_v11, 7 }
 0x1b5   :  { %v4289_v16 = vadd.f32 %v669_v7, %v515_v13  ;;  %v446_v17 = vpop.f32.mrf.mxu1  ;;  %v682_v18 = vpop.f32.mrf.mxu0 }
 0x1b6   :  { %v520_v21 = vsel %vm505_vm1, 0.0, %v489_v15  ;;  %v487_v5 = vrot.slane %v446_v17, 7 }
 0x1b7   :  { %v4292_v45 = vadd.f32 %v3366_v12, %v520_v21  ;;  %v3335_v22 = vpop.f32.mrf.mxu1  ;;  %v3367_v6 = vpop.f32.mrf.mxu0 }
 0x1b8   :  { %v518_v23 = vsel %vm505_vm1, 0.0, %v487_v5 }
 0x1b9   :  { %v4295_v46 = vadd.f32 %v682_v18, %v518_v23  ;;  %v449_v24 = vpop.f32.mrf.mxu1  ;;  %v685_v0 = vpop.f32.mrf.mxu0 }
 0x1ba   :  { %v488_v25 = vrot.slane %v449_v24, 7 }
 0x1bb   :  { %v3386_v19 = vpop.f32.mrf.mxu1 }
 0x1bc   :  { %v519_v20 = vsel %vm505_vm1, 0.0, %v488_v25  ;;  %v888_v27 = vrot.slane %v3386_v19, 1  ;;  %v3418_v28 = vpop.f32.mrf.mxu0 }
 0x1bd   :  { %v4298_v29 = vadd.f32 %v685_v0, %v519_v20  ;;  %v810_v30 = vpop.f32.mrf.mxu1  ;;  %v1126_v49 = vrot.slane %v3418_v28, 7 }
 0x1be   :  { %v919_v34 = vsel %vm915_vm2, %v888_v27, 0.0  ;;  %v886_v32 = vrot.slane %v810_v30, 1  ;;  %v4304_v35 = vpop.f32.mrf.mxu0  ;;  %v2341_v30 = vld [vmem:[%s4938_s7 + $0x8] sm:$0xff] }
 0x1bf   :  { %v934_v37 = vadd.f32 %v919_v34, %v4259_v63  ;;  %v3387_v38 = vpop.f32.mrf.mxu1  ;;  %v1158_v2 = vsel %vm505_vm1, 0.0, %v1126_v49 }
 0x1c0   :  { %v917_v39 = vsel %vm915_vm2, %v886_v32, 0.0  ;;  %v889_v40 = vrot.slane %v3387_v38, 1  ;;  %v3419_v42 = vpop.f32.mrf.mxu0 }
 0x1c1   :  { %v932_v43 = vadd.f32 %v917_v39, %v4262_v26  ;;  %v1127_v44 = vrot.slane %v3419_v42, 7  ;;  %v813_v48 = vpop.f32.mrf.mxu1 }
 0x1c2   :  { %v920_v50 = vsel %vm915_vm2, %v889_v40, 0.0  ;;  %v887_v51 = vrot.slane %v813_v48, 1  ;;  %v1048_v52 = vpop.f32.mrf.mxu0 }
 0x1c3   :  { %v935_v53 = vadd.f32 %v920_v50, %v4265_v31  ;;  %v1159_v63 = vsel %vm505_vm1, 0.0, %v1127_v44  ;;  %v1125_v54 = vrot.slane %v1048_v52, 7  ;;  %v3390_v56 = vpop.f32.mrf.mxu1  ;;  %v475_v52 = vrot.slane %v4945_v14, 7 }
 0x1c4   :  { %v918_v57 = vsel %vm915_vm2, %v887_v51, 0.0  ;;  %v892_v58 = vrot.slane %v3390_v56, 1  ;;  %v3422_v59 = vpop.f32.mrf.mxu0  ;;  %v4314_v61 = vadd.f32 %v1159_v63, %v934_v37  ;;  %v885_v56 = vrot.slane %v4945_v14, 1 }
 0x1c5   :  { %v933_v26 = vadd.f32 %v918_v57, %v4268_v36  ;;  %v1157_v62 = vsel %vm505_vm1, 0.0, %v1125_v54  ;;  %v826_v1 = vpop.f32.mrf.mxu1  ;;  %v1130_v22 = vrot.slane %v3422_v59, 7 }
 0x1c6   :  { %v923_v4 = vsel %vm915_vm2, %v892_v58, 0.0  ;;  %v890_v31 = vrot.slane %v826_v1, 1  ;;  %v1061_v7 = vpop.f32.mrf.mxu0  ;;  %v4320_v8 = vadd.f32 %v1157_v62, %v932_v43 }
 0x1c7   :  { %v938_v9 = vadd.f32 %v923_v4, %v4271_v41  ;;  %v1128_v11 = vrot.slane %v1061_v7, 7  ;;  %v3391_v12 = vpop.f32.mrf.mxu1  ;;  %v4323_v13 = vadd.f32 %v1158_v2, %v933_v26  ;;  %v1162_v37 = vsel %vm505_vm1, 0.0, %v1130_v22 }
 0x1c8   :  { %v921_v15 = vsel %vm915_vm2, %v890_v31, 0.0  ;;  %v3423_v36 = vpop.f32.mrf.mxu0  ;;  %v4368_v7 = vsel %vm505_vm1, 0.0, %v475_v52 }
 0x1c9   :  { %v936_v17 = vadd.f32 %v921_v15, %v4274_v47  ;;  %v1160_v18 = vsel %vm505_vm1, 0.0, %v1128_v11  ;;  %v1131_v21 = vrot.slane %v3423_v36, 7  ;;  %v829_v5 = vpop.f32.mrf.mxu1  ;;  %v2342_v47 = vld [vmem:[%s4938_s7 + $0x10] sm:$0xff]  ;;  %v1124_v11 = vrot.slane %v4304_v35, 7 }
 0x1ca   :  { %v891_v6 = vrot.slane %v829_v5, 1  ;;  %v1064_v23 = vpop.f32.mrf.mxu0  ;;  %v4328_v24 = vadd.f32 %v1160_v18, %v935_v53  ;;  %3595 = vmatpush3.msra.mxu0 %v2342_v47  ;;  %v4376_v36 = vsel %vm915_vm2, %v885_v56, 0.0 }
 0x1cb   :  { %v1163_v41 = vsel %vm505_vm1, 0.0, %v1131_v21  ;;  %v1129_v0 = vrot.slane %v1064_v23, 7  ;;  %v3394_v25 = vpop.f32.mrf.mxu1  ;;  %3596 = vmatprep.subr.mxu0 %v4945_v14 }
 0x1cc   :  { %v922_v19 = vsel %vm915_vm2, %v891_v6, 0.0  ;;  %v895_v20 = vrot.slane %v3394_v25, 1  ;;  %v3426_v27 = vpop.f32.mrf.mxu0  ;;  %v4332_v28 = vadd.f32 %v1163_v41, %v938_v9  ;;  %3597 = vmatpush3.msra.mxu0 %v2341_v30  ;;  %v4388_v25 = vadd.f32 %v4376_v36, %v4368_v7 }
 0x1cd   :  { %v937_v33 = vadd.f32 %v922_v19, %v4277_v55  ;;  %v1161_v34 = vsel %vm505_vm1, 0.0, %v1129_v0  ;;  %v841_v32 = vpop.f32.mrf.mxu1  ;;  %v2340_v55 = vld [vmem:[%s4938_s7] sm:$0xff]  ;;  %3598 = vmatprep.subr.mxu0 %v4945_v14  ;;  %v1156_v19 = vsel %vm505_vm1, 0.0, %v1124_v11 }
 0x1ce   :  { %v926_v38 = vsel %vm915_vm2, %v895_v20, 0.0  ;;  %v893_v39 = vrot.slane %v841_v32, 1  ;;  %v4346_v40 = vpop.f32.mrf.mxu0  ;;  %v4348_v42 = vadd.f32 %v1161_v34, %v936_v17  ;;  %3599 = vmatpush3.msra.mxu0 %v2340_v55 }
 0x1cf   :  { %v941_v43 = vadd.f32 %v926_v38, %v4280_v60  ;;  %v3395_v44 = vpop.f32.mrf.mxu1  ;;  %v4355_v48 = vadd.f32 %v1162_v37, %v937_v33  ;;  %v1134_v60 = vrot.slane %v3426_v27, 7  ;;  %3603 = vmatprep.subr.mxu0 %v4945_v14 }
 0x1d0   :  { %v924_v49 = vsel %vm915_vm2, %v893_v39, 0.0  ;;  %v896_v50 = vrot.slane %v3395_v44, 1  ;;  %v3427_v51 = vpop.f32.mrf.mxu0  ;;  %v1172_v44 = vadd.f32 %v1156_v19, %v4388_v25 }
 0x1d1   :  { %v939_v53 = vadd.f32 %v924_v49, %v4283_v3  ;;  %v1135_v63 = vrot.slane %v3427_v51, 7  ;;  %v844_v54 = vpop.f32.mrf.mxu1  ;;  %v1166_v17 = vsel %vm505_vm1, 0.0, %v1134_v60 }
 0x1d2   :  { %v927_v57 = vsel %vm915_vm2, %v896_v50, 0.0  ;;  %v894_v58 = vrot.slane %v844_v54, 1  ;;  %v1080_v59 = vpop.f32.mrf.mxu0 }
 0x1d3   :  { %v942_v26 = vadd.f32 %v927_v57, %v4286_v10  ;;  %v1167_v62 = vsel %vm505_vm1, 0.0, %v1135_v63  ;;  %v1133_v1 = vrot.slane %v1080_v59, 7  ;;  %v3398_v2 = vpop.f32.mrf.mxu1 }
 0x1d4   :  { %v925_v3 = vsel %vm915_vm2, %v894_v58, 0.0  ;;  %v899_v4 = vrot.slane %v3398_v2, 1  ;;  %v3430_v31 = vpop.f32.mrf.mxu0  ;;  %v4370_v9 = vadd.f32 %v1167_v62, %v941_v43 }
 0x1d5   :  { %v940_v12 = vadd.f32 %v925_v3, %v4289_v16  ;;  %v1165_v15 = vsel %vm505_vm1, 0.0, %v1133_v1  ;;  %v857_v10 = vpop.f32.mrf.mxu1 }
 0x1d6   :  { %v930_v18 = vsel %vm915_vm2, %v899_v4, 0.0  ;;  %v897_v21 = vrot.slane %v857_v10, 1  ;;  %v1093_v5 = vpop.f32.mrf.mxu0  ;;  %v4380_v22 = vadd.f32 %v1165_v15, %v939_v53 }
 0x1d7   :  { %v945_v6 = vadd.f32 %v930_v18, %v4292_v45  ;;  %v1136_v23 = vrot.slane %v1093_v5, 7  ;;  %v3399_v35 = vpop.f32.mrf.mxu1  ;;  %v4383_v41 = vadd.f32 %v1166_v17, %v940_v12  ;;  %v1138_v45 = vrot.slane %v3430_v31, 7 }
 0x1d8   :  { %v928_v16 = vsel %vm915_vm2, %v897_v21, 0.0  ;;  %v3431_v0 = vpop.f32.mrf.mxu0 }
 0x1d9   :  { %v943_v20 = vadd.f32 %v928_v16, %v4295_v46  ;;  %v1168_v27 = vsel %vm505_vm1, 0.0, %v1136_v23  ;;  %v1139_v47 = vrot.slane %v3431_v0, 7  ;;  %v860_v30 = vpop.f32.mrf.mxu1  ;;  %v1170_v53 = vsel %vm505_vm1, 0.0, %v1138_v45 }
 0x1da   :  { %v898_v33 = vrot.slane %v860_v30, 1  ;;  %v1096_v34 = vpop.f32.mrf.mxu0  ;;  %v4393_v32 = vadd.f32 %v1168_v27, %v942_v26 }
 0x1db   :  { %v1171_v37 = vsel %vm505_vm1, 0.0, %v1139_v47  ;;  %v1137_v38 = vrot.slane %v1096_v34, 7  ;;  %v3450_v39 = vpop.f32.mrf.mxu1 }
 0x1dc   :  { %v929_v55 = vsel %vm915_vm2, %v898_v33, 0.0  ;;  %v1352_v43 = vadd.f32 %v3450_v39, %v4323_v13  ;;  %v4399_v46 = vadd.f32 %v1171_v37, %v945_v6 }
 0x1dd   :  { %v944_v49 = vadd.f32 %v929_v55, %v4298_v29  ;;  %v1169_v50 = vsel %vm505_vm1, 0.0, %v1137_v38  ;;  %v3482_v51 = vpop.f32.mrf.mxu0  ;;  %v1287_v52 = vpop.f32.mrf.mxu1 }
 0x1de   :  { %v1546_v63 = vrot.slane %v3482_v51, 1  ;;  %v1350_v54 = vadd.f32 %v1287_v52, %v1172_v44  ;;  %v4404_v56 = vadd.f32 %v1169_v50, %v943_v20 }
 0x1df   :  { %v1465_v60 = vpop.f32.mrf.mxu0  ;;  %v3451_v57 = vpop.f32.mrf.mxu1  ;;  %v1186_v58 = vadd.f32 %v1170_v53, %v944_v49 }
 0x1e0   :  { %v1578_v13 = vsel %vm915_vm2, %v1546_v63, 0.0  ;;  %v1544_v59 = vrot.slane %v1465_v60, 1  ;;  %v1353_v26 = vadd.f32 %v3451_v57, %v4314_v61  ;;  %v1132_v61 = vrot.slane %v4346_v40, 7 }
 0x1e1   :  { %v4408_v62 = vadd.f32 %v1578_v13, %v1352_v43  ;;  %v3483_v29 = vpop.f32.mrf.mxu0  ;;  %v1290_v1 = vpop.f32.mrf.mxu1 }
 0x1e2   :  { %v1576_v2 = vsel %vm915_vm2, %v1544_v59, 0.0  ;;  %v1547_v3 = vrot.slane %v3483_v29, 1  ;;  %v1351_v4 = vadd.f32 %v1290_v1, %v4320_v8  ;;  %v1164_v40 = vsel %vm505_vm1, 0.0, %v1132_v61 }
 0x1e3   :  { %v4412_v31 = vadd.f32 %v1576_v2, %v1350_v54  ;;  %v1468_v11 = vpop.f32.mrf.mxu0  ;;  %v3454_v12 = vpop.f32.mrf.mxu1  ;;  %v1180_v43 = vadd.f32 %v1164_v40, %v4388_v25 }
 0x1e4   :  { %v1579_v15 = vsel %vm915_vm2, %v1547_v3, 0.0  ;;  %v1545_v10 = vrot.slane %v1468_v11, 1  ;;  %v1356_v17 = vadd.f32 %v3454_v12, %v4355_v48 }
 0x1e5   :  { %v4417_v18 = vadd.f32 %v1579_v15, %v1353_v26  ;;  %v3486_v21 = vpop.f32.mrf.mxu0  ;;  %v1303_v5 = vpop.f32.mrf.mxu1 }
 0x1e6   :  { %v1577_v6 = vsel %vm915_vm2, %v1545_v10, 0.0  ;;  %v1550_v23 = vrot.slane %v3486_v21, 1  ;;  %v1354_v8 = vadd.f32 %v1303_v5, %v4328_v24 }
 0x1e7   :  { %v4421_v35 = vadd.f32 %v1577_v6, %v1351_v4  ;;  %v1481_v16 = vpop.f32.mrf.mxu0  ;;  %v3455_v0 = vpop.f32.mrf.mxu1 }
 0x1e8   :  { %v1582_v19 = vsel %vm915_vm2, %v1550_v23, 0.0  ;;  %v1548_v20 = vrot.slane %v1481_v16, 1  ;;  %v1357_v48 = vadd.f32 %v3455_v0, %v4332_v28 }
 0x1e9   :  { %v4426_v27 = vadd.f32 %v1582_v19, %v1356_v17  ;;  %v3487_v47 = vpop.f32.mrf.mxu0  ;;  %v1306_v30 = vpop.f32.mrf.mxu1 }
 0x1ea   :  { %v1580_v45 = vsel %vm915_vm2, %v1548_v20, 0.0  ;;  %v1551_v33 = vrot.slane %v3487_v47, 1  ;;  %v1355_v24 = vadd.f32 %v1306_v30, %v4348_v42 }
 0x1eb   :  { %v4430_v34 = vadd.f32 %v1580_v45, %v1354_v8  ;;  %v1484_v37 = vpop.f32.mrf.mxu0  ;;  %v3458_v38 = vpop.f32.mrf.mxu1 }
 0x1ec   :  { %v1583_v39 = vsel %vm915_vm2, %v1551_v33, 0.0  ;;  %v1549_v55 = vrot.slane %v1484_v37, 1  ;;  %v1360_v28 = vadd.f32 %v3458_v38, %v4383_v41  ;;  %v4498_v38 = vld [vmem:[%s4931_s0 + $0x8] sm:$0xff] }
 0x1ed   :  { %v4435_v44 = vadd.f32 %v1583_v39, %v1357_v48  ;;  %v3490_v49 = vpop.f32.mrf.mxu0  ;;  %v1319_v50 = vpop.f32.mrf.mxu1  ;;  %4963 = vst [vmem:[#allocation6_spill] sm:$0xff] %v4498_v38  ;;  %v2249_v39 = vsel %vm155_vm0, %v4498_v38, 0.0 }
 0x1ee   :  { %v1581_v51 = vsel %vm915_vm2, %v1549_v55, 0.0  ;;  %v1554_v52 = vrot.slane %v3490_v49, 1  ;;  %v4438_v53 = vadd.f32 %v1319_v50, %v1180_v43  ;;  %v4505_v55 = vld [vmem:[%s4931_s0 + $0x40] sm:$0xff]  ;;  %v4512_v43 = vld [vmem:[%s4931_s0 + $0x48] sm:$0xff] }
 0x1ef   :  { %v4440_v42 = vadd.f32 %v1581_v51, %v1355_v24  ;;  %v4442_v63 = vpop.f32.mrf.mxu0  ;;  %v3459_v54 = vpop.f32.mrf.mxu1  ;;  %v4491_v24 = vld [vmem:[%s4931_s0] sm:$0xff]  ;;  %4964 = vst [vmem:[#allocation7_spill] sm:$0xff] %v4505_v55  ;;  %4965 = vst [vmem:[#allocation8_spill] sm:$0xff] %v4512_v43  ;;  %v2270_v49 = vsel %vm155_vm0, %v4512_v43, 0.0 }
 0x1f0   :  { %v1586_v60 = vsel %vm915_vm2, %v1554_v52, 0.0  ;;  %v1361_v41 = vadd.f32 %v3459_v54, %v4370_v9  ;;  %4962 = vst [vmem:[#allocation5_spill] sm:$0xff] %v4491_v24  ;;  %v2248_v37 = vsel %vm155_vm0, %v4491_v24, 0.0 }
 0x1f1   :  { %v4446_v57 = vadd.f32 %v1586_v60, %v1360_v28  ;;  %v3491_v25 = vpop.f32.mrf.mxu0  ;;  %v4448_v13 = vpop.f32.mrf.mxu1  ;;  %v2269_v28 = vsel %vm155_vm0, %v4505_v55, 0.0  ;;  %v2250_v60 = vadd.f32 %v2249_v39, %v2248_v37 }
 0x1f2   :  { %v1555_v59 = vrot.slane %v3491_v25, 1  ;;  %v4527_v25 = vld [vmem:[%s4931_s0 + $0x10] sm:$0xff] }
 0x1f3   :  { %v4450_v26 = vpop.f32.mrf.mxu0  ;;  %v3462_v29 = vpop.f32.mrf.mxu1  ;;  %4966 = vst [vmem:[#allocation9_spill] sm:$0xff] %v4527_v25 }
 0x1f4   :  { %v1587_v1 = vsel %vm915_vm2, %v1555_v59, 0.0  ;;  %v1364_v2 = vadd.f32 %v3462_v29, %v1186_v58  ;;  %v2251_v59 = vsel %vm155_vm0, %v4527_v25, 0.0  ;;  %v4534_v29 = vld [vmem:[%s4931_s0 + $0x50] sm:$0xff]  ;;  %v1553_v43 = vrot.slane %v4450_v26, 1 }
 0x1f5   :  { %v4453_v3 = vadd.f32 %v1587_v1, %v1361_v41  ;;  %v3494_v4 = vpop.f32.mrf.mxu0  ;;  %v4455_v11 = vpop.f32.mrf.mxu1  ;;  %v2271_v41 = vadd.f32 %v2270_v49, %v2269_v28  ;;  %4967 = vst [vmem:[#allocation10_spill] sm:$0xff] %v4534_v29  ;;  %v2272_v1 = vsel %vm155_vm0, %v4534_v29, 0.0  ;;  %v1831_v26 = vadd.f32 %v4435_v44, %v4368_v7 }
 0x1f6   :  { %v1558_v12 = vrot.slane %v3494_v4, 1  ;;  %v1359_v44 = vadd.f32 %v4448_v13, %v4380_v22 }
 0x1f7   :  { %v4457_v15 = vpop.f32.mrf.mxu0  ;;  %v3463_v9 = vpop.f32.mrf.mxu1 }
 0x1f8   :  { %v1590_v10 = vsel %vm915_vm2, %v1558_v12, 0.0  ;;  %v1365_v17 = vadd.f32 %v3463_v9, %v4399_v46 }
 0x1f9   :  { %v4461_v61 = vadd.f32 %v1590_v10, %v1364_v2  ;;  %v3495_v21 = vpop.f32.mrf.mxu0  ;;  %v4463_v5 = vpop.f32.mrf.mxu1  ;;  %v2252_v10 = vadd.f32 %v2251_v59, %v2250_v60  ;;  %v4565_v60 = vld [vmem:[%s4931_s0 + $0x20] sm:$0xff] }
 0x1fa   :  { %v1559_v6 = vrot.slane %v3495_v21, 1  ;;  %v4547_v21 = vld [vmem:[%s4931_s0 + $0x18] sm:$0xff]  ;;  %4970 = vst [vmem:[#allocation13_spill] sm:$0xff] %v4565_v60  ;;  %v4572_v59 = vld [vmem:[%s4931_s0 + $0x60] sm:$0xff] }
 0x1fb   :  { %v4465_v58 = vpop.f32.mrf.mxu0  ;;  %v4467_v23 = vpop.f32.mrf.mxu1  ;;  %4968 = vst [vmem:[#allocation11_spill] sm:$0xff] %v4547_v21  ;;  %4971 = vst [vmem:[#allocation14_spill] sm:$0xff] %v4572_v59 }
 0x1fc   :  { %v1591_v8 = vsel %vm915_vm2, %v1559_v6, 0.0  ;;  %v2253_v6 = vsel %vm155_vm0, %v4547_v21, 0.0 }
 0x1fd   :  { %v4470_v16 = vadd.f32 %v1591_v8, %v1365_v17  ;;  %v4472_v0 = vpop.f32.mrf.mxu0  ;;  %v1707_v19 = vpop.f32.mrf.mxu1  ;;  %v2273_v17 = vadd.f32 %v2272_v1, %v2271_v41  ;;  %v4554_v8 = vld [vmem:[%s4931_s0 + $0x58] sm:$0xff]  ;;  %v2254_v28 = vadd.f32 %v2253_v6, %v2252_v10  ;;  %v2255_v41 = vsel %vm155_vm0, %v4565_v60, 0.0 }
 0x1fe   :  { %4969 = vst [vmem:[#allocation12_spill] sm:$0xff] %v4554_v8  ;;  %v2274_v19 = vsel %vm155_vm0, %v4554_v8, 0.0  ;;  %v2276_v1 = vsel %vm155_vm0, %v4572_v59, 0.0  ;;  %v4591_v59 = vld [vmem:[%s4931_s0 + $0x68] sm:$0xff] }
 0x1ff   :  { %v1939_v20 = vpop.f32.mrf.mxu0  ;;  %v4474_v48 = vpop.f32.mrf.mxu1  ;;  %v2275_v49 = vadd.f32 %v2274_v19, %v2273_v17  ;;  %v2256_v17 = vadd.f32 %v2255_v41, %v2254_v28  ;;  %v1783_v19 = vrot.slane %v4467_v23, 7  ;;  %4973 = vst [vmem:[#allocation16_spill] sm:$0xff] %v4591_v59  ;;  %v2278_v29 = vsel %vm155_vm0, %v4591_v59, 0.0  ;;  %v4607_v59 = vld [vmem:[%s4931_s0 + $0x30] sm:$0xff] }
 0x200   :  { %v1784_v23 = vrot.slane %v4474_v48, 7  ;;  %v1552_v41 = vrot.slane %v4442_v63, 1  ;;  %4974 = vst [vmem:[#allocation17_spill] sm:$0xff] %v4607_v59  ;;  %v2259_v48 = vsel %vm155_vm0, %v4607_v59, 0.0  ;;  %v4614_v63 = vld [vmem:[%s4931_s0 + $0x70] sm:$0xff] }
 0x201   :  { %v4476_v46 = vpop.f32.mrf.mxu0  ;;  %v4478_v40 = vpop.f32.mrf.mxu1  ;;  %v2277_v6 = vadd.f32 %v2276_v1, %v2275_v49  ;;  %v1811_v60 = vsel %vm505_vm1, 0.0, %v1783_v19  ;;  %4975 = vst [vmem:[#allocation18_spill] sm:$0xff] %v4614_v63 }
 0x202   :  { %v1782_v49 = vrot.slane %v4478_v40, 7  ;;  %v1812_v19 = vsel %vm505_vm1, 0.0, %v1784_v23 }
 0x203   :  { %v4480_v47 = vpop.f32.mrf.mxu0  ;;  %v4482_v30 = vpop.f32.mrf.mxu1  ;;  %v2279_v55 = vadd.f32 %v2278_v29, %v2277_v6 }
 0x204   :  { %v1810_v59 = vsel %vm505_vm1, 0.0, %v1782_v49  ;;  %v1787_v38 = vrot.slane %v4482_v30, 7  ;;  %v4644_v49 = vadd.f32 %v1831_v26, %v4376_v36 }
 0x205   :  { %v4484_v45 = vpop.f32.mrf.mxu0  ;;  %v4486_v33 = vpop.f32.mrf.mxu1  ;;  %v1824_v22 = vadd.f32 %v1810_v59, %v4412_v31 }
 0x206   :  { %v1785_v40 = vrot.slane %v4486_v33, 7  ;;  %v1825_v33 = vadd.f32 %v1811_v60, %v4421_v35  ;;  %v1815_v31 = vsel %vm505_vm1, 0.0, %v1787_v38  ;;  %v1557_v38 = vrot.slane %v4465_v58, 1 }
 0x207   :  { %v4516_v50 = vpop.f32.mrf.mxu0  ;;  %v4518_v51 = vpop.f32.mrf.mxu1 }
 0x208   :  { %v1788_v23 = vrot.slane %v4518_v51, 7  ;;  %v1813_v35 = vsel %vm505_vm1, 0.0, %v1785_v40  ;;  %v4656_v51 = vadd.f32 %v4455_v11, %v4393_v32  ;;  %v1829_v40 = vadd.f32 %v1815_v31, %v4440_v42 }
 0x209   :  { %v4520_v52 = vpop.f32.mrf.mxu0  ;;  %v4522_v54 = vpop.f32.mrf.mxu1  ;;  %v1827_v59 = vadd.f32 %v1813_v35, %v4417_v18 }
 0x20b   :  { %v4538_v2 = vpop.f32.mrf.mxu0  ;;  %v4540_v4 = vpop.f32.mrf.mxu1 }
 0x20d   :  { %v4542_v12 = vpop.f32.mrf.mxu0  ;;  %v1738_v9 = vpop.f32.mrf.mxu1 }
 0x20f   :  { %v1970_v20 = vpop.f32.mrf.mxu0  ;;  %v4558_v37 = vpop.f32.mrf.mxu1 }
 0x210   :  { %v4584_v20 = vld [vmem:[%s4931_s0 + $0x28] sm:$0xff] }
 0x211   :  { %v4560_v39 = vpop.f32.mrf.mxu1  ;;  %4972 = vst [vmem:[#allocation15_spill] sm:$0xff] %v4584_v20  ;;  %v2257_v14 = vsel %vm155_vm0, %v4584_v20, 0.0  ;;  %v1584_v20 = vsel %vm915_vm2, %v1552_v41, 0.0  ;;  %v1826_v41 = vadd.f32 %v1812_v19, %v4408_v62  ;;  %v2001_v62 = vadd.f32 %v4472_v0, %v1825_v33 }
 0x212   :  { %v2258_v8 = vadd.f32 %v2257_v14, %v2256_v17  ;;  %v2280_v14 = vsel %vm155_vm0, %v4614_v63, 0.0  ;;  %v4624_v17 = vld [vmem:[%s4931_s0 + $0x38] sm:$0xff]  ;;  %v4650_v30 = vadd.f32 %v1584_v20, %v4438_v53  ;;  %v1816_v53 = vsel %vm505_vm1, 0.0, %v1788_v23 }
 0x213   :  { %v4576_v9 = vpop.f32.mrf.mxu1  ;;  %4976 = vst [vmem:[#allocation19_spill] sm:$0xff] %v4624_v17  ;;  %v4628_v6 = vsel %vm155_vm0, %v4624_v17, 0.0  ;;  %v4639_v25 = vadd.f32 %v2280_v14, %v2279_v55  ;;  %v1585_v17 = vsel %vm915_vm2, %v1553_v43, 0.0  ;;  %v1786_v55 = vrot.slane %v4522_v54, 7 }
 0x214   :  { %v4637_v24 = vadd.f32 %v2259_v48, %v2258_v8  ;;  %v1601_v8 = vadd.f32 %v1585_v17, %v1359_v44  ;;  %v2002_v48 = vadd.f32 %v4476_v46, %v1826_v41  ;;  %v1790_v14 = vrot.slane %v4540_v4, 7 }
 0x215   :  { %v4578_v10 = vpop.f32.mrf.mxu1  ;;  %v1556_v0 = vrot.slane %v4457_v15, 1  ;;  %v1814_v18 = vsel %vm505_vm1, 0.0, %v1786_v55  ;;  %v2003_v17 = vadd.f32 %v4516_v50, %v1827_v59  ;;  %v1791_v19 = vrot.slane %v4558_v37, 7  ;;  %v3555_v15 = vpop.f32.mrf.mxu0 }
 0x216   :  { %v1828_v33 = vadd.f32 %v1814_v18, %v4430_v34  ;;  %v1818_v23 = vsel %vm505_vm1, 0.0, %v1790_v14 }
 0x217   :  { %v4595_v28 = vpop.f32.mrf.mxu1  ;;  %v1972_v31 = vpop.f32.mrf.mxu0 }
 0x219   :  { %v4600_v1 = vpop.f32.mrf.mxu1 }
 0x21b   :  { %v3578_v29 = vpop.f32.mrf.mxu1 }
 0x21c   :  { %v2191_v63 = vrot.slane %v3578_v29, 1  ;;  %v1830_v29 = vadd.f32 %v1816_v53, %v4426_v27  ;;  %v2004_v53 = vadd.f32 %v4538_v2, %v1828_v33 }
 0x21d   :  { %v2115_v21 = vpop.f32.mrf.mxu1 }
 0x21e   :  { %v2219_v21 = vsel %vm915_vm2, %v2191_v63, 0.0  ;;  %v2000_v63 = vadd.f32 %v4480_v47, %v1824_v22  ;;  %v1789_v22 = vrot.slane %v4560_v39, 7  ;;  %v2006_v55 = vadd.f32 %v4520_v52, %v1830_v29 }
 0x21f   :  { %v3579_v13 = vpop.f32.mrf.mxu1  ;;  %v4666_v32 = vadd.f32 %v2219_v21, %v2001_v62  ;;  %v1819_v62 = vsel %vm505_vm1, 0.0, %v1791_v19  ;;  %v1363_v29 = vadd.f32 %v4463_v5, %v4404_v56 }
 0x220   :  { %v2192_v43 = vrot.slane %v3579_v13, 1  ;;  %v2005_v13 = vadd.f32 %v4484_v45, %v1829_v40  ;;  %v1792_v45 = vrot.slane %v4578_v10, 7  ;;  %v1834_v18 = vadd.f32 %v1819_v62, %v4446_v57 }
 0x221   :  { %v2117_v60 = vpop.f32.mrf.mxu1  ;;  %v2293_v42 = vsel %vm155_vm0, %v4666_v32, 0.0 }
 0x222   :  { %v2220_v20 = vsel %vm915_vm2, %v2192_v43, 0.0  ;;  %v2190_v54 = vrot.slane %v2117_v60, 1  ;;  %v1820_v57 = vsel %vm505_vm1, 0.0, %v1792_v45 }
 0x223   :  { %v3582_v11 = vpop.f32.mrf.mxu1  ;;  %v4674_v46 = vadd.f32 %v2220_v20, %v2002_v48  ;;  %v1833_v20 = vadd.f32 %v1818_v23, %v1601_v8  ;;  %v1817_v48 = vsel %vm505_vm1, 0.0, %v1789_v22  ;;  %v1588_v8 = vsel %vm915_vm2, %v1556_v0, 0.0 }
 0x224   :  { %v2218_v26 = vsel %vm915_vm2, %v2190_v54, 0.0  ;;  %v2195_v44 = vrot.slane %v3582_v11, 1  ;;  %v1793_v23 = vrot.slane %v4600_v1, 7 }
 0x225   :  { %v4676_v47 = vadd.f32 %v2218_v26, %v2000_v63  ;;  %v2130_v4 = vpop.f32.mrf.mxu1  ;;  %v2295_v34 = vsel %vm155_vm0, %v4674_v46, 0.0  ;;  %v1794_v26 = vrot.slane %v4576_v9, 7  ;;  %v2009_v5 = vadd.f32 %v4542_v12, %v1833_v20 }
 0x226   :  { %v2193_v58 = vrot.slane %v2130_v4, 1  ;;  %v2223_v60 = vsel %vm915_vm2, %v2195_v44, 0.0  ;;  %v1589_v4 = vsel %vm915_vm2, %v1557_v38, 0.0  ;;  %v1832_v44 = vadd.f32 %v1817_v48, %v4650_v30 }
 0x227   :  { %v2292_v27 = vsel %vm155_vm0, %v4676_v47, 0.0  ;;  %v3583_v41 = vpop.f32.mrf.mxu1  ;;  %v4705_v40 = vadd.f32 %v2223_v60, %v2005_v13  ;;  %v2010_v38 = vadd.f32 %v3555_v15, %v1834_v18  ;;  %v1821_v62 = vsel %vm505_vm1, 0.0, %v1793_v23 }
 0x228   :  { %v2294_v35 = vadd.f32 %v2293_v42, %v2292_v27  ;;  %v2221_v50 = vsel %vm915_vm2, %v2193_v58, 0.0  ;;  %v2196_v37 = vrot.slane %v3583_v41, 1  ;;  %v1822_v27 = vsel %vm505_vm1, 0.0, %v1794_v26 }
 0x229   :  { %v4692_v21 = vadd.f32 %v2221_v50, %v2003_v17  ;;  %v2133_v43 = vpop.f32.mrf.mxu1  ;;  %v3558_v17 = vpop.f32.mrf.mxu0  ;;  %v2301_v30 = vsel %vm155_vm0, %v4705_v40, 0.0  ;;  %v2008_v13 = vadd.f32 %v1972_v31, %v1832_v44 }
 0x22a   :  { %v2296_v39 = vadd.f32 %v2295_v34, %v2294_v35  ;;  %v2194_v59 = vrot.slane %v2133_v43, 1  ;;  %v2224_v63 = vsel %vm915_vm2, %v2196_v37, 0.0  ;;  %v1795_v35 = vrot.slane %v4595_v28, 7 }
 0x22b   :  { %v2297_v52 = vsel %vm155_vm0, %v4692_v21, 0.0  ;;  %v3586_v54 = vpop.f32.mrf.mxu1  ;;  %v4715_v58 = vadd.f32 %v2224_v63, %v2006_v55  ;;  %v1985_v22 = vpop.f32.mrf.mxu0  ;;  %v1835_v55 = vadd.f32 %v1820_v57, %v4453_v3  ;;  %v1605_v43 = vadd.f32 %v1589_v4, %v1363_v29  ;;  %v4750_v4 = vld [vmem:[%s4931_s0 + $0x78] sm:$0xff] }
 0x22c   :  { %v2222_v14 = vsel %vm915_vm2, %v2194_v59, 0.0  ;;  %v2198_v11 = vrot.slane %v3586_v54, 1  ;;  %v2298_v19 = vadd.f32 %v2297_v52, %v2296_v39  ;;  %v2305_v28 = vsel %vm155_vm0, %v4644_v49, 0.0 }
 0x22d   :  { %v4707_v2 = vadd.f32 %v2222_v14, %v2004_v53  ;;  %v2146_v10 = vpop.f32.mrf.mxu1  ;;  %v2303_v12 = vsel %vm155_vm0, %v4715_v58, 0.0  ;;  %v1604_v59 = vadd.f32 %v1588_v8, %v4656_v51  ;;  %v1837_v20 = vadd.f32 %v1822_v27, %v1605_v43  ;;  %v3559_v52 = vpop.f32.mrf.mxu0 }
 0x22e   :  { %v2226_v42 = vsel %vm915_vm2, %v2198_v11, 0.0  ;;  %v1823_v45 = vsel %vm505_vm1, 0.0, %v1795_v35  ;;  %v2011_v63 = vadd.f32 %v1985_v22, %v1835_v55 }
 0x22f   :  { %v2299_v9 = vsel %vm155_vm0, %v4707_v2, 0.0  ;;  %v3587_v33 = vpop.f32.mrf.mxu1  ;;  %v4730_v15 = vadd.f32 %v2226_v42, %v2009_v5  ;;  %v1836_v14 = vadd.f32 %v1821_v62, %v1604_v59  ;;  %v1838_v44 = vadd.f32 %v1823_v45, %v4461_v61  ;;  %v1988_v23 = vpop.f32.mrf.mxu0 }
 0x230   :  { %v2300_v0 = vadd.f32 %v2299_v9, %v2298_v19  ;;  %v2199_v56 = vrot.slane %v3587_v33, 1  ;;  %v2282_v19 = vsel %vm155_vm0, %v4750_v4, 0.0  ;;  %v2013_v5 = vadd.f32 %v3558_v17, %v1837_v20 }
 0x231   :  { %v2148_v41 = vpop.f32.mrf.mxu1  ;;  %v2314_v11 = vsel %vm155_vm0, %v4730_v15, 0.0  ;;  %v2283_v35 = vadd.f32 %v2282_v19, %v4639_v25 }
 0x232   :  { %v2302_v50 = vadd.f32 %v2301_v30, %v2300_v0  ;;  %v2227_v37 = vsel %vm915_vm2, %v2199_v56, 0.0  ;;  %v2197_v1 = vrot.slane %v2148_v41, 1  ;;  %v2262_v30 = vadd.f32 %v4628_v6, %v4637_v24 }
 0x233   :  { %v3590_v34 = vpop.f32.mrf.mxu1  ;;  %v4737_v31 = vadd.f32 %v2227_v37, %v2010_v38  ;;  %v2012_v38 = vadd.f32 %v1988_v23, %v1836_v14  ;;  %v2014_v37 = vadd.f32 %v3559_v52, %v1838_v44  ;;  %v2284_v43 = vrot.slane %v2283_v35, 4 }
 0x234   :  { %v2304_v60 = vadd.f32 %v2303_v12, %v2302_v50  ;;  %v2225_v39 = vsel %vm915_vm2, %v2197_v1, 0.0  ;;  %v2202_v54 = vrot.slane %v3590_v34, 1  ;;  %v1839_v50 = vadd.f32 %v4470_v16, %v4368_v7 }
 0x235   :  { %v4739_v3 = vadd.f32 %v2225_v39, %v2008_v13  ;;  %v2161_v53 = vpop.f32.mrf.mxu1  ;;  %v2316_v57 = vsel %vm155_vm0, %v4737_v31, 0.0  ;;  %v2263_v34 = vrot.slane %v2262_v30, 4  ;;  %v2285_v59 = vadd.f32 %v2284_v43, %v2283_v35  ;;  %v2596_v43 = vld [vmem:[%s4941_s10] sm:$0xf]  ;;  %s3754_s10 = smov 32  }
 0x236   :  { %v2200_v48 = vrot.slane %v2161_v53, 1  ;;  %v2306_v26 = vadd.f32 %v2305_v28, %v2304_v60  ;;  %v2230_v0 = vsel %vm915_vm2, %v2202_v54, 0.0  ;;  %v4778_v25 = vadd.f32 %v1839_v50, %v4376_v36 }
 0x237   :  { %v2313_v18 = vsel %vm155_vm0, %v4739_v3, 0.0  ;;  %v3591_v51 = vpop.f32.mrf.mxu1  ;;  %v4769_v1 = vadd.f32 %v2230_v0, %v2013_v5  ;;  %v2264_v28 = vadd.f32 %v2263_v34, %v2262_v30  ;;  %v2286_v36 = vrot.slane %v2285_v59, 2  ;;  %v2339_v0 = vld [vmem:[%s4937_s6 + $0x18] sm:$0xff]  ;;  %v2337_v30 = vld [vmem:[%s4937_s6 + $0x8] sm:$0xff] }
 0x238   :  { %v2315_v10 = vadd.f32 %v2314_v11, %v2313_v18  ;;  %v2228_v8 = vsel %vm915_vm2, %v2200_v48, 0.0  ;;  %v2203_v29 = vrot.slane %v3591_v51, 1  ;;  %v2307_v61 = vrot.slane %v2306_v26, 4 }
 0x239   :  { %v4757_v9 = vadd.f32 %v2228_v8, %v2011_v63  ;;  %v2164_v33 = vpop.f32.mrf.mxu1  ;;  %v2322_v7 = vsel %vm155_vm0, %v4769_v1, 0.0  ;;  %v2326_v53 = vsel %vm155_vm0, %v4778_v25, 0.0  ;;  %v2265_v54 = vrot.slane %v2264_v28, 2 }
 0x23a   :  { %v2317_v42 = vadd.f32 %v2316_v57, %v2315_v10  ;;  %v2201_v56 = vrot.slane %v2164_v33, 1  ;;  %v2231_v41 = vsel %vm915_vm2, %v2203_v29, 0.0  ;;  %v2308_v6 = vadd.f32 %v2307_v61, %v2306_v26  ;;  %v2336_v61 = vld [vmem:[%s4937_s6] sm:$0xff] }
 0x23b   :  { %v2318_v27 = vsel %vm155_vm0, %v4757_v9, 0.0  ;;  %v4773_v55 = vadd.f32 %v2231_v41, %v2014_v37  ;;  %v2266_v11 = vadd.f32 %v2265_v54, %v2264_v28  ;;  %v2287_v18 = vadd.f32 %v2286_v36, %v2285_v59 }
 0x23c   :  { %v2229_v22 = vsel %vm915_vm2, %v2201_v56, 0.0  ;;  %v2319_v13 = vadd.f32 %v2318_v27, %v2317_v42  ;;  %v2309_v60 = vrot.slane %v2308_v6, 2  ;;  %v2338_v56 = vld [vmem:[%s4937_s6 + $0x10] sm:$0xff]  ;;  %v4977_v5 = vmov 0.0  }
 0x23d   :  { %v4771_v17 = vadd.f32 %v2229_v22, %v2012_v38  ;;  %v2324_v62 = vsel %vm155_vm0, %v4773_v55, 0.0  ;;  %v2267_v8 = vrot.slane %v2266_v11, 1  ;;  %v2288_v29 = vrot.slane %v2287_v18, 1  ;;  %v2504_v22 = vld [vmem:[%s4940_s9] sm:$0xf] }
 0x23e   :  { %v2310_v52 = vadd.f32 %v2309_v60, %v2308_v6 }
 0x23f   :  { %v2320_v24 = vsel %vm155_vm0, %v4771_v17, 0.0  ;;  %v2268_v33 = vadd.f32 %v2267_v8, %v2266_v11  ;;  %v2289_v23 = vadd.f32 %v2288_v29, %v2287_v18  ;;  %v2687_v18 = vlaneseq }
 0x240   :  { %v2321_v12 = vadd.f32 %v2320_v24, %v2319_v13  ;;  %v2311_v14 = vrot.slane %v2310_v52, 1  ;;  %v3109_v13 = vld [vmem:[%s4939_s8] ss:$0 sm:$0xff] }
 0x241   :  { %v2290_v38 = vmul.f32 0.015625, %v2268_v33  ;;  %v2291_v27 = vmul.f32 0.015625, %v2289_v23 }
 0x242   :  { %v2323_v16 = vadd.f32 %v2322_v7, %v2321_v12  ;;  %v2312_v26 = vadd.f32 %v2311_v14, %v2310_v52  ;;  %v3110_v7 = vld [vmem:[%s4942_s11] ss:$0 sm:$0xff]  ;;  %v3753_v14 = vmov 1966171168   ;;  %s3755_s11 = smov [#allocation2]  }
 0x243   :  { %v2422_v41 = vsel %vm2346_vm4, %v2291_v27, %v2290_v38  ;;  %v2685_v11 = vunpack.c.l.s4 %v3753_v14 }
 0x244   :  { %v2325_v39 = vadd.f32 %v2324_v62, %v2323_v16  ;;  %v2334_v44 = vmul.f32 0.015625, %v2312_v26 }
 0x245   :  { %v2686_v26 = vunpack.c.0.s8 %v2685_v11  ;;  %v4985_v11 = vld [vmem:[#allocation17_spill] sm:$0xff] }
 0x246   :  { %v2327_v20 = vadd.f32 %v2326_v53, %v2325_v39  ;;  %v3113_v39 = vld [vmem:[%s4943_s12] ss:$0 sm:$0xff]  ;;  %s2883_s12 = sshll.u32 %s3755_s11, 4  ;;  %s2884_s12 = int_to_ptr.vmem [resolvable:$true] %s2883_s12 }
 0x247   :  { %s3729_s7 = scalar_lea.vmem %s2884_s12, 2048  ;;  %p3734_p1 = scmp.lt.s32.totalorder %s2884_s12, %s2884_s12 }
 0x248   :  { %v2328_v45 = vrot.slane %v2327_v20, 4  ;;  %p3730_p0 = scmp.ne.s32.totalorder %s2884_s12, %s3729_s7  ;;  %p3735_p2 = scmp.lt.s32.totalorder %s3729_s7, %s3729_s7 }
 0x24a   :  { %v2329_v48 = vadd.f32 %v2328_v45, %v2327_v20  ;;  %p3736_p3 = por %p3735_p2, %p3734_p1 }
 0x24c   :  { %v2330_v63 = vrot.slane %v2329_v48, 2  ;;  %p3737_p4 = pnand %p3736_p3, %p3730_p0 }
 0x24e   :  { %v2331_v51 = vadd.f32 %v2330_v63, %v2329_v48 }
 0x250   :  { %v2332_v10 = vrot.slane %v2331_v51, 1 }
 0x252   :  { %v2333_v19 = vadd.f32 %v2332_v10, %v2331_v51  ;;  %v2688_v10 = vshrl.u32 %v2687_v18, 7 }
 0x254   :  { %v2335_v57 = vmul.f32 0.015625, %v2333_v19  ;;  %v2689_v8 = vsub.s32 %v2686_v26, %v2688_v10 }
 0x256   :  { %v2347_v42 = vsel %vm2346_vm4, %v2335_v57, %v2334_v44  ;;  %v2708_v44 = vsub.s32 0, %v2688_v10 }
 0x257   :  { %3601 = vmatmul.mubr.msk.f32.vlgmr.msra.gmra.mxu0 %vm155_vm0, %v2347_v42 }
 0x258   :  { %3604 = vmatpush3.msra.mxu0 %v2339_v0  ;;  %3611 = vmatprep.mubr.msk.f32.mxu0 %vm3752_vm3, %v4977_v5 }
 0x259   :  { %3605 = vmatprep.subr.mxu0 %v4977_v5 }
 0x25a   :  { %3606 = vmatpush3.msra.mxu0 %v2338_v56 }
 0x25b   :  { %3607 = vmatprep.subr.mxu0 %v4977_v5 }
 0x25c   :  { %3608 = vmatpush3.msra.mxu0 %v2337_v30 }
 0x25d   :  { %3609 = vmatprep.subr.mxu0 %v4977_v5 }
 0x25e   :  { %3610 = vmatpush3.msra.mxu0 %v2336_v61 }
 0x25f   :  { %3612 = vmatmul.mubr.msk.f32.vlgmr.msra.gmra.mxu0 %vm155_vm0, %v2422_v41  ;;  %3614 = vmatprep.subr.mxu0 %v4977_v5 }
 0x260   :  { %3616 = vmatprep.mubr.msk.f32.mxu0 %vm3752_vm3, %v4977_v5  ;;  %3615 = vmatpush3.msk.msra.mxu0 %vm2516_vm5, %v2504_v22 }
 0x261   :  { %3619 = vmatprep.subr.mxu0 %v4977_v5 }
 0x317   :  { %v2416_v35 = vpop.f32.mrf.mxu0 }
 0x319   :  { %v3602_v50 = vpop.f32.mrf.mxu0 }
 0x31f   :  { %v2491_v37 = vpop.f32.mrf.mxu0 }
 0x320   :  { %v2492_v24 = vadd.f32 %v2491_v37, %v2416_v35 }
 0x321   :  { %v3613_v6 = vpop.f32.mrf.mxu0 }
 0x322   :  { %v2502_v12 = vadd.f32 %v3109_v13, %v2492_v24 }
 0x324   :  { %v2503_v34 = vmax.f32 %v2502_v12, 0.0 }
 0x326   :  { %3617 = vmatmul.mubr.msk.f32.vlgmr.msra.gmra.mxu0 %vm2512_vm6, %v2503_v34 }
 0x327   :  { %3620 = vmatpush3.msk.msra.mxu0 %vm2516_vm5, %v2596_v43  ;;  %3621 = vmatprep.mubr.msk.f32.mxu0 %vm3752_vm3, %v4977_v5 }
 0x32a   :  { %3622 = vmatmul.mubr.msk.f32.vlgmr.msra.gmra.mxu0 %vm2512_vm6, %v2503_v34 }
 0x3e6   :  { %v2586_v16 = vpop.f32.mrf.mxu0 }
 0x3e7   :  { %v2587_v62 = vadd.f32 %v3110_v7, %v2586_v16  ;;  %v4981_v7 = vld [vmem:[#allocation6_spill] sm:$0xff] }
 0x3e8   :  { %v3618_v60 = vpop.f32.mrf.mxu0 }
 0x3e9   :  { %v2590_v28 = vsub.f32 0.0, %v2587_v62 }
 0x3ea   :  { %v2673_v59 = vpop.f32.mrf.mxu0 }
 0x3eb   :  { %v2591_v53 = vmul.f32 1.442695, %v2590_v28  ;;  %v2674_v20 = vadd.f32 %v3113_v39, %v2673_v59  ;;  %v4982_v59 = vld [vmem:[#allocation15_spill] sm:$0xff] }
 0x3ec   :  { %v3623_v45 = vpop.f32.mrf.mxu0 }
 0x3ed   :  { %3705 = vpow2.f32 %v2591_v53  ;;  %v2677_v52 = vsub.f32 0.0, %v2674_v20  ;;  %v4983_v20 = vld [vmem:[#allocation13_spill] sm:$0xff] }
 0x3ef   :  { %v2678_v54 = vmul.f32 1.442695, %v2677_v52 }
 0x3f1   :  { %3707 = vpow2.f32 %v2678_v54 }
 0x3fa   :  { %v3706_v36 = vpop.eup %3705 }
 0x3fb   :  { %v2593_v48 = vadd.f32 1.0, %v3706_v36 }
 0x3fd   :  { %3709 = vrcp.f32 %v2593_v48 }
 0x3fe   :  { %v3708_v63 = vpop.eup %3707 }
 0x3ff   :  { %v2680_v51 = vadd.f32 1.0, %v3708_v63  ;;  %v4984_v63 = vld [vmem:[#allocation19_spill] sm:$0xff] }
 0x401   :  { %3711 = vrcp.f32 %v2680_v51 }
 0x40a   :  { %v3710_v29 = vpop.eup %3709 }
 0x40b   :  { %v2690_v19 = vrot.slane %v3710_v29, %v2689_v8  ;;  %v4986_v29 = vld [vmem:[#allocation8_spill] sm:$0xff] }
 0x40d   :  { %v2691_v57 = vcombine.high %v2690_v19, %v2690_v19  ;;  %v2698_v33 = vrot.slane %v2690_v19, %v2689_v8 }
 0x40e   :  { %v3712_v23 = vpop.eup %3711 }
 0x40f   :  { %v2705_v0 = vrot.slane %v2691_v57, %v2689_v8  ;;  %v4828_v42 = vrot.slane %v2698_v33, %v2708_v44  ;;  %v2739_v56 = vrot.slane %v3712_v23, %v2689_v8 }
 0x411   :  { %v4830_v5 = vrot.slane %v2705_v0, %v2708_v44  ;;  %v2747_v38 = vrot.slane %v2739_v56, %v2689_v8  ;;  %v2740_v41 = vcombine.high %v2739_v56, %v2739_v56  ;;  %v2717_v16 = vmul.f32 %v4981_v7, %v4828_v42  ;;  %v4988_v56 = vld [vmem:[#allocation12_spill] sm:$0xff] }
 0x412   :  { %v2721_v53 = vmul.f32 %v4982_v59, %v4828_v42  ;;  %v2720_v45 = vmul.f32 %v4983_v20, %v4828_v42  ;;  %v2723_v14 = vmul.f32 %v4984_v63, %v4828_v42  ;;  %v2722_v18 = vmul.f32 %v4985_v11, %v4828_v42 }
 0x413   :  { %v2758_v27 = vrot.slane %v2747_v38, %v2708_v44  ;;  %v2754_v50 = vrot.slane %v2740_v41, %v2689_v8  ;;  %v2725_v19 = vmul.f32 %v4986_v29, %v4830_v5  ;;  %v2727_v38 = vmul.f32 %v4988_v56, %v4830_v5 }
 0x415   :  { %v2767_v30 = vmul.f32 %v2758_v27, %v4674_v46  ;;  %v2765_v61 = vmul.f32 %v2758_v27, %v4676_v47  ;;  %v2768_v22 = vmul.f32 %v2758_v27, %v4692_v21  ;;  %v2766_v35 = vmul.f32 %v2758_v27, %v4666_v32 }
 0x416   :  { %v2770_v37 = vmul.f32 %v2758_v27, %v4705_v40  ;;  %v2769_v46 = vmul.f32 %v2758_v27, %v4707_v2  ;;  %v2762_v47 = vrot.slane %v2754_v50, %v2708_v44  ;;  %v2772_v13 = vmul.f32 %v2758_v27, %v4644_v49  ;;  %v4987_v44 = vld [vmem:[#allocation7_spill] sm:$0xff]  ;;  %v4990_v50 = vld [vmem:[#allocation16_spill] sm:$0xff] }
 0x417   :  { %2801 = vrot.lane.b32.xlu1 %v2767_v30, %s3754_s10  ;;  %2797 = vrot.lane.b32.xlu0 %v2765_v61, %s3754_s10  ;;  %v2771_v21 = vmul.f32 %v2758_v27, %v4715_v58  ;;  %v2724_v57 = vmul.f32 %v4987_v44, %v4830_v5  ;;  %v4989_v27 = vld [vmem:[#allocation10_spill] sm:$0xff] }
 0x418   :  { %v2774_v32 = vmul.f32 %v2762_v47, %v4730_v15  ;;  %v2773_v24 = vmul.f32 %v2762_v47, %v4739_v3  ;;  %v2776_v40 = vmul.f32 %v2762_v47, %v4757_v9  ;;  %v2775_v2 = vmul.f32 %v2762_v47, %v4737_v31  ;;  %v4978_v31 = vld [vmem:[#allocation9_spill] sm:$0xff] }
 0x419   :  { %v2778_v49 = vmul.f32 %v2762_v47, %v4769_v1  ;;  %v2777_v58 = vmul.f32 %v2762_v47, %v4771_v17  ;;  %v2780_v15 = vmul.f32 %v2762_v47, %v4778_v25  ;;  %v2779_v3 = vmul.f32 %v2762_v47, %v4773_v55  ;;  %v4979_v1 = vld [vmem:[#allocation5_spill] sm:$0xff]  ;;  %v4980_v55 = vld [vmem:[#allocation11_spill] sm:$0xff] }
 0x41a   :  { %v2718_v9 = vmul.f32 %v4978_v31, %v4828_v42  ;;  %v2716_v6 = vmul.f32 %v4979_v1, %v4828_v42  ;;  %v2719_v25 = vmul.f32 %v4980_v55, %v4828_v42  ;;  %v2726_v30 = vmul.f32 %v4989_v27, %v4830_v5 }
 0x41b   :  { %2803 = vrot.lane.b32.xlu1 %v2768_v22, %s3754_s10  ;;  %2799 = vrot.lane.b32.xlu0 %v2766_v35, %s3754_s10 }
 0x41f   :  { %2807 = vrot.lane.b32.xlu1 %v2770_v37, %s3754_s10  ;;  %2805 = vrot.lane.b32.xlu0 %v2769_v46, %s3754_s10  ;;  %v2729_v37 = vmul.f32 %v4990_v50, %v4830_v5  ;;  %v4991_v46 = vld [vmem:[#allocation14_spill] sm:$0xff] }
 0x420   :  { %v2728_v47 = vmul.f32 %v4991_v46, %v4830_v5 }
 0x423   :  { %2811 = vrot.lane.b32.xlu1 %v2772_v13, %s3754_s10  ;;  %2809 = vrot.lane.b32.xlu0 %v2771_v21, %s3754_s10 }
 0x427   :  { %2815 = vrot.lane.b32.xlu1 %v2774_v32, %s3754_s10  ;;  %2813 = vrot.lane.b32.xlu0 %v2773_v24, %s3754_s10 }
 0x42b   :  { %2819 = vrot.lane.b32.xlu1 %v2776_v40, %s3754_s10  ;;  %2817 = vrot.lane.b32.xlu0 %v2775_v2, %s3754_s10  ;;  %v2731_v40 = vmul.f32 %v4750_v4, %v4830_v5  ;;  %v4992_v2 = vld [vmem:[#allocation18_spill] sm:$0xff] }
 0x42f   :  { %2823 = vrot.lane.b32.xlu1 %v2778_v49, %s3754_s10  ;;  %2821 = vrot.lane.b32.xlu0 %v2777_v58, %s3754_s10  ;;  %v2730_v49 = vmul.f32 %v4992_v2, %v4830_v5 }
 0x433   :  { %2827 = vrot.lane.b32.xlu1 %v2780_v15, %s3754_s10  ;;  %2825 = vrot.lane.b32.xlu0 %v2779_v3, %s3754_s10 }
 0x489   :  { %v2802_v17 = vpop.permute.xlu1 %2801  ;;  %v2798_v12 = vpop.permute.xlu0 %2797 }
 0x48a   :  { %v2847_v34 = vsel %vm155_vm0, %v2718_v9, %v2802_v17  ;;  %v2845_v43 = vsel %vm155_vm0, %v2716_v6, %v2798_v12 }
 0x48b   :  { %2864 = vst.msk [vmem:[#allocation2 + $0x10] sm:$0xff] %vm2861_vm7, %v2847_v34  ;;  %2862 = vst.msk [vmem:[#allocation2] sm:$0xff] %vm2861_vm7, %v2845_v43 }
 0x48d   :  { %v2804_v62 = vpop.permute.xlu1 %2803  ;;  %v2800_v60 = vpop.permute.xlu0 %2799 }
 0x48e   :  { %v2848_v39 = vsel %vm155_vm0, %v2719_v25, %v2804_v62  ;;  %v2846_v28 = vsel %vm155_vm0, %v2717_v16, %v2800_v60 }
 0x48f   :  { %2865 = vst.msk [vmem:[#allocation2 + $0x18] sm:$0xff] %vm2861_vm7, %v2848_v39  ;;  %2863 = vst.msk [vmem:[#allocation2 + $0x8] sm:$0xff] %vm2861_vm7, %v2846_v28 }
 0x491   :  { %v2808_v52 = vpop.permute.xlu1 %2807  ;;  %v2806_v54 = vpop.permute.xlu0 %2805 }
 0x492   :  { %v2850_v36 = vsel %vm155_vm0, %v2721_v53, %v2808_v52  ;;  %v2849_v48 = vsel %vm155_vm0, %v2720_v45, %v2806_v54 }
 0x493   :  { %2867 = vst.msk [vmem:[#allocation2 + $0x28] sm:$0xff] %vm2861_vm7, %v2850_v36  ;;  %2866 = vst.msk [vmem:[#allocation2 + $0x20] sm:$0xff] %vm2861_vm7, %v2849_v48 }
 0x495   :  { %v2812_v51 = vpop.permute.xlu1 %2811  ;;  %v2810_v26 = vpop.permute.xlu0 %2809 }
 0x496   :  { %v2852_v10 = vsel %vm155_vm0, %v2723_v14, %v2812_v51  ;;  %v2851_v8 = vsel %vm155_vm0, %v2722_v18, %v2810_v26 }
 0x497   :  { %2869 = vst.msk [vmem:[#allocation2 + $0x38] sm:$0xff] %vm2861_vm7, %v2852_v10  ;;  %2868 = vst.msk [vmem:[#allocation2 + $0x30] sm:$0xff] %vm2861_vm7, %v2851_v8 }
 0x499   :  { %v2816_v33 = vpop.permute.xlu1 %2815  ;;  %v2814_v23 = vpop.permute.xlu0 %2813 }
 0x49a   :  { %v2854_v0 = vsel %vm155_vm0, %v2725_v19, %v2816_v33  ;;  %v2853_v42 = vsel %vm155_vm0, %v2724_v57, %v2814_v23 }
 0x49b   :  { %2871 = vst.msk [vmem:[#allocation2 + $0x48] sm:$0xff] %vm2861_vm7, %v2854_v0  ;;  %2870 = vst.msk [vmem:[#allocation2 + $0x40] sm:$0xff] %vm2861_vm7, %v2853_v42 }
 0x49d   :  { %v2820_v61 = vpop.permute.xlu1 %2819  ;;  %v2818_v41 = vpop.permute.xlu0 %2817 }
 0x49e   :  { %v2856_v22 = vsel %vm155_vm0, %v2727_v38, %v2820_v61  ;;  %v2855_v35 = vsel %vm155_vm0, %v2726_v30, %v2818_v41 }
 0x49f   :  { %2873 = vst.msk [vmem:[#allocation2 + $0x58] sm:$0xff] %vm2861_vm7, %v2856_v22  ;;  %2872 = vst.msk [vmem:[#allocation2 + $0x50] sm:$0xff] %vm2861_vm7, %v2855_v35 }
 0x4a1   :  { %v2824_v13 = vpop.permute.xlu1 %2823  ;;  %v2822_v21 = vpop.permute.xlu0 %2821 }
 0x4a2   :  { %v2858_v32 = vsel %vm155_vm0, %v2729_v37, %v2824_v13  ;;  %v2857_v24 = vsel %vm155_vm0, %v2728_v47, %v2822_v21 }
 0x4a3   :  { %2875 = vst.msk [vmem:[#allocation2 + $0x68] sm:$0xff] %vm2861_vm7, %v2858_v32  ;;  %2874 = vst.msk [vmem:[#allocation2 + $0x60] sm:$0xff] %vm2861_vm7, %v2857_v24 }
 0x4a5   :  { %v2828_v58 = vpop.permute.xlu1 %2827  ;;  %v2826_v15 = vpop.permute.xlu0 %2825 }
 0x4a6   :  { %v2860_v3 = vsel %vm155_vm0, %v2731_v40, %v2828_v58  ;;  %v2859_v31 = vsel %vm155_vm0, %v2730_v49, %v2826_v15 }
 0x4a7   :  { %2877 = vst.msk [vmem:[#allocation2 + $0x78] sm:$0xff] %vm2861_vm7, %v2860_v3  ;;  %2876 = vst.msk [vmem:[#allocation2 + $0x70] sm:$0xff] %vm2861_vm7, %v2859_v31 }
 0x4a8   :  { %3740 = shalt.err (!%p3737_p4)
}
 0x4a9   :  { %s3756_s15 = smov 128   ;;  %s3757_s16 = smov 8  }
 0x4aa   :  { %2889 = dma.vmem_to_hbm [thread:$0]  %s2884_s12, 2048, %s4944_s13, [#allocation3], %s3756_s15, %s3756_s15, %s3757_s16  }
 0x4ab   :  { %3749 = dma.done.wait [#allocation3], 2048  }
 0x4ac   :  { %3750 = vsyncadd [#allocation3], 4294965248 }
 0x4ad   :  { %2893 = vsyncpa [#allocation3], 1 }

</bundles_post_ra>
